<compile_context>
chip_gen: v7x
topology: tpu7x:2x2x1
jax: 0.10.0
libtpu: 0.0.40
codegen_flags: <defaults>
</compile_context>

<pallas_src>
import jax
import jax.numpy as jnp
from jax.experimental import pallas as pl
from jax.experimental.pallas import tpu as pltpu

# ---- tiny synthetic "matscibert" config -------------------------------------
S = 8          # sequence length
H = 32         # hidden size
NH = 2         # attention heads
DH = H // NH   # head dim
I = 64         # FFN intermediate size
L = 2          # number of encoder layers
VOCAB = 64
MAXPOS = 16
NL = 16        # number of relation labels
NLP = 128      # lane-dense padded logits width (last dim multiple of 128)

# ---- slab layouts (all offsets sublane/lane aligned) -------------------------
EMB_ROWS = 96                       # word 0..63 | pos 64..71 | type 72 | ln_g 80 | ln_b 88
WORD_OFF, POS_OFF, TYPE_OFF, LNG_OFF, LNB_OFF = 0, 64, 72, 80, 88
WCOLS = 384                         # [qkv_w (96) @0 | o_w (32) @128 | f1_w (64) @256]
QKV_OFF, OW_OFF, F1_OFF = 0, 128, 256
(ROW_QKVB, ROW_OB, ROW_LN1G, ROW_LN1B,
 ROW_F1B, ROW_F2B, ROW_LN2G, ROW_LN2B) = range(8)   # rows of the (L, 8, 128) vec slab
HEAD_ROWS = 72                      # cls_w1 rows 0..31 | cls_w2 rows 32..63 | cls_b row 64

TAGS = ['Amount_Of', 'Apparatus_Attr_Of', 'Apparatus_Of', 'Atmospheric_Material',
        'Brand_Of', 'Condition_Of', 'Coref_Of', 'Descriptor_Of', 'Next_Operation',
        'Number_Of', 'Participant_Material', 'Property_Of', 'Recipe_Precursor',
        'Recipe_Target', 'Solvent_Material', 'Type_Of']


# ---------------- single fused Pallas kernel (per batch element) --------------

def _re_fused_kernel(ids_ref, marker_ref,          # SMEM scalar-prefetch: (B,S), (B,2)
                     mask_ref,                     # (1, 1, S) f32 per-batch block
                     emb_ref,                      # (EMB_ROWS, H)
                     wmat_ref,                     # (L, H, WCOLS)
                     f2w_ref,                      # (L, I, H)
                     vec_ref,                      # (L, 8, 128) biases + LN params
                     head_ref,                     # (HEAD_ROWS, NLP)
                     out_ref,                      # (1, 8, NLP)
                     x_scr):                       # VMEM scratch (S, H)
    f32 = jnp.float32
    b = pl.program_id(0)

    def layernorm(x, g, bt):
        mu = jnp.mean(x, axis=-1, keepdims=True)
        var = jnp.mean(jnp.square(x - mu), axis=-1, keepdims=True)
        return (x - mu) * jax.lax.rsqrt(var + 1e-12) * g + bt

    # --- embeddings: unrolled dynamic row gathers (ids live in SMEM) ----------
    # TODO(synk): no bounds check — ids >= VOCAB would silently read other slab rows.
    for i in range(S):
        x_scr[i:i + 1, :] = emb_ref[pl.ds(ids_ref[b, i], 1), :]
    x = x_scr[...]
    x = x + emb_ref[POS_OFF:POS_OFF + S, :] + emb_ref[TYPE_OFF:TYPE_OFF + 1, :]
    x = layernorm(x, emb_ref[LNG_OFF:LNG_OFF + 1, :], emb_ref[LNB_OFF:LNB_OFF + 1, :])

    add_mask = (1.0 - mask_ref[0]) * (-1e9)        # (1, S) additive attention mask
    scale = 1.0 / (DH ** 0.5)

    for l in range(L):                             # static unroll, L = 2
        qkv_w = wmat_ref[l, :, QKV_OFF:QKV_OFF + 3 * H]
        o_w = wmat_ref[l, :, OW_OFF:OW_OFF + H]
        f1_w = wmat_ref[l, :, F1_OFF:F1_OFF + I]

        # fused QKV projection: one (S,H)x(H,3H) MXU pass
        qkv = (jnp.dot(x, qkv_w, preferred_element_type=f32)
               + vec_ref[l, ROW_QKVB:ROW_QKVB + 1, 0:3 * H])              # (S, 3H)

        attn = jnp.zeros((S, H), f32)
        for h in range(NH):                        # heads: accumulate into W_O row slices
            qh = qkv[:, h * DH:(h + 1) * DH] * scale
            kh = qkv[:, H + h * DH:H + (h + 1) * DH]
            vh = qkv[:, 2 * H + h * DH:2 * H + (h + 1) * DH]
            s = jax.lax.dot_general(qh, kh, (((1,), (1,)), ((), ())),
                                    preferred_element_type=f32) + add_mask  # (S, S)
            s = s - jnp.max(s, axis=-1, keepdims=True)
            p = jnp.exp(s)
            p = p / jnp.sum(p, axis=-1, keepdims=True)                      # exact softmax
            ctx = jnp.dot(p, vh, preferred_element_type=f32)                # (S, DH)
            attn = attn + jnp.dot(ctx, o_w[h * DH:(h + 1) * DH, :],
                                  preferred_element_type=f32)               # sublane-aligned rows
        attn = attn + vec_ref[l, ROW_OB:ROW_OB + 1, 0:H]
        x = layernorm(attn + x,
                      vec_ref[l, ROW_LN1G:ROW_LN1G + 1, 0:H],
                      vec_ref[l, ROW_LN1B:ROW_LN1B + 1, 0:H])

        ff = jnp.dot(x, f1_w, preferred_element_type=f32) + vec_ref[l, ROW_F1B:ROW_F1B + 1, 0:I]
        # TODO(synk): HF BERT uses exact erf-GELU; tanh approximation used here.
        ff = 0.5 * ff * (1.0 + jnp.tanh(0.7978845608028654 * (ff + 0.044715 * ff * ff * ff)))
        ff = jnp.dot(ff, f2w_ref[l], preferred_element_type=f32) + vec_ref[l, ROW_F2B:ROW_F2B + 1, 0:H]
        x = layernorm(ff + x,
                      vec_ref[l, ROW_LN2G:ROW_LN2G + 1, 0:H],
                      vec_ref[l, ROW_LN2B:ROW_LN2B + 1, 0:H])

    # --- RC head: one (2,S) one-hot gather for [h(e1); h(e2)], split-W classifier ---
    # TODO(synk): nn.Dropout(0.1) is identity at inference; omitted.
    e1 = marker_ref[b, 0]
    e2 = marker_ref[b, 1]
    row_iota = jax.lax.broadcasted_iota(jnp.int32, (2, S), 0)
    col_iota = jax.lax.broadcasted_iota(jnp.int32, (2, S), 1)
    sel = (col_iota == jnp.where(row_iota == 0, e1, e2)).astype(f32)        # (2, S)
    h12 = jnp.dot(sel, x, preferred_element_type=f32)                       # (2, H)
    y = (jnp.dot(h12[0:1, :], head_ref[0:H, :], preferred_element_type=f32)
         + jnp.dot(h12[1:2, :], head_ref[H:2 * H, :], preferred_element_type=f32)
         + head_ref[2 * H:2 * H + 1, :])                                    # (1, NLP) lane-dense
    out_ref[0] = jnp.broadcast_to(y, (8, NLP)).astype(out_ref.dtype)        # unmasked (8,128) store


# ---------------- parameter init (deterministic, synthetic slabs) -------------

def init_params(key):
    def nrm(k, shape):
        return (0.02 * jax.random.normal(k, shape)).astype(jnp.float32)

    keys = iter(jax.random.split(key, 4 + 4 * L))

    emb = jnp.zeros((EMB_ROWS, H), jnp.float32)
    emb = emb.at[WORD_OFF:WORD_OFF + VOCAB].set(nrm(next(keys), (VOCAB, H)))
    emb = emb.at[POS_OFF:POS_OFF + S].set(nrm(next(keys), (MAXPOS, H))[:S])
    emb = emb.at[TYPE_OFF].set(nrm(next(keys), (2, H))[0])
    emb = emb.at[LNG_OFF].set(jnp.ones((H,), jnp.float32))      # emb LN gamma (beta stays 0)

    wmat = jnp.zeros((L, H, WCOLS), jnp.float32)
    f2 = jnp.zeros((L, I, H), jnp.float32)
    vec = jnp.zeros((L, 8, 128), jnp.float32)
    for l in range(L):
        lk = jax.random.split(next(keys), 4)
        wmat = wmat.at[l, :, QKV_OFF:QKV_OFF + 3 * H].set(nrm(lk[0], (H, 3 * H)))
        wmat = wmat.at[l, :, OW_OFF:OW_OFF + H].set(nrm(lk[1], (H, H)))
        wmat = wmat.at[l, :, F1_OFF:F1_OFF + I].set(nrm(lk[2], (H, I)))
        f2 = f2.at[l].set(nrm(lk[3], (I, H)))
        vec = vec.at[l, ROW_LN1G, 0:H].set(1.0)
        vec = vec.at[l, ROW_LN2G, 0:H].set(1.0)                 # all biases / betas stay 0

    head = jnp.zeros((HEAD_ROWS, NLP), jnp.float32)
    cls_w = nrm(next(keys), (2 * H, NL))                        # nn.Linear(2H, 16), bias 0
    head = head.at[0:H, 0:NL].set(cls_w[:H])
    head = head.at[H:2 * H, 0:NL].set(cls_w[H:])

    return {"emb": emb, "wmat": wmat, "f2": f2, "vec": vec, "head": head}


# ---------------- forward (BERT_RC equivalent, batched) ------------------------

def re_forward(params, input_ids, attention_mask, entity_marker):
    B = input_ids.shape[0]
    mask3 = attention_mask.astype(jnp.float32).reshape(B, 1, S)

    grid_spec = pltpu.PrefetchScalarGridSpec(
        num_scalar_prefetch=2,                        # ids + entity markers -> SMEM
        grid=(B,),
        in_specs=[
            pl.BlockSpec((1, 1, S), lambda b, *_: (b, 0, 0)),        # mask (per batch)
            pl.BlockSpec((EMB_ROWS, H), lambda b, *_: (0, 0)),       # emb slab (resident)
            pl.BlockSpec((L, H, WCOLS), lambda b, *_: (0, 0, 0)),    # qkv|o|f1 weights
            pl.BlockSpec((L, I, H), lambda b, *_: (0, 0, 0)),        # f2 weights
            pl.BlockSpec((L, 8, 128), lambda b, *_: (0, 0, 0)),      # biases + LN params
            pl.BlockSpec((HEAD_ROWS, NLP), lambda b, *_: (0, 0)),    # classifier head
        ],
        out_specs=pl.BlockSpec((1, 8, NLP), lambda b, *_: (b, 0, 0)),
        scratch_shapes=[pltpu.VMEM((S, H), jnp.float32)],
    )
    out = pl.pallas_call(
        _re_fused_kernel,
        out_shape=jax.ShapeDtypeStruct((B, 8, NLP), jnp.float32),
        grid_spec=grid_spec,
        compiler_params=pltpu.CompilerParams(
            dimension_semantics=("parallel",)),       # batch axis -> both TCs on v7x
    )(input_ids.astype(jnp.int32), entity_marker.astype(jnp.int32), mask3,
      params["emb"], params["wmat"], params["f2"], params["vec"], params["head"])
    return out[:, 0, :NL]                             # (B, 16) logits


# ---------------- main ---------------------------------------------------------

if __name__ == "__main__":
    # TODO(synk): Tokenizer_RC string normalization/tokenization has no Pallas
    # equivalent; synthetic token ids / entity markers are built directly.
    key = jax.random.PRNGKey(0)
    params = init_params(key)

    B = 4
    base = jnp.array([2, 60, 61, 17, 23, 62, 63, 3], dtype=jnp.int32)   # [CLS] ... [SEP]
    input_ids = (base[None, :] + 3 * jnp.arange(B, dtype=jnp.int32)[:, None]) % VOCAB
    attention_mask = jnp.ones((B, S), dtype=jnp.int32)
    entity_marker = jnp.array([[1, 5], [2, 6], [1, 4], [3, 6]], dtype=jnp.int32)

    fwd = jax.jit(re_forward)
    logits = fwd(params, input_ids, attention_mask, entity_marker)
    logits = jax.block_until_ready(logits)
    preds = jnp.argmax(logits, axis=1)
    _ = [TAGS[int(p)] for p in preds]
    print("KERNEL_OK")
</pallas_src>

<mosaic_0001>
module attributes {stable_mosaic.version = 11 : i64} {
  func.func @_re_fused_kernel(%arg0: i32, %arg1: memref<4x8xi32, #tpu.memory_space<smem>>, %arg2: memref<4x2xi32, #tpu.memory_space<smem>>, %arg3: memref<1x1x8xf32, #tpu.memory_space<vmem>>, %arg4: memref<96x32xf32, #tpu.memory_space<vmem>>, %arg5: memref<2x32x384xf32, #tpu.memory_space<vmem>>, %arg6: memref<2x64x32xf32, #tpu.memory_space<vmem>>, %arg7: memref<2x8x128xf32, #tpu.memory_space<vmem>>, %arg8: memref<72x128xf32, #tpu.memory_space<vmem>>, %arg9: memref<1x8x128xf32, #tpu.memory_space<vmem>>, %arg10: memref<8x32xf32, #tpu.memory_space<vmem>>) attributes {dimension_semantics = [#tpu.dimension_semantics<parallel>], iteration_bounds = array<i64: 4>, scalar_prefetch = 2 : i64, scratch_operands = 1 : i64, tpu.core_type = #tpu.core_type<tc>, window_params = [{transform_indices = @transform_0, window_bounds = array<i64: 1, 1, 8>}, {pipeline_mode = #tpu.pipeline_mode<synchronous>, transform_indices = @transform_1, window_bounds = array<i64: 96, 32>}, {pipeline_mode = #tpu.pipeline_mode<synchronous>, transform_indices = @transform_2, window_bounds = array<i64: 2, 32, 384>}, {pipeline_mode = #tpu.pipeline_mode<synchronous>, transform_indices = @transform_3, window_bounds = array<i64: 2, 64, 32>}, {pipeline_mode = #tpu.pipeline_mode<synchronous>, transform_indices = @transform_4, window_bounds = array<i64: 2, 8, 128>}, {pipeline_mode = #tpu.pipeline_mode<synchronous>, transform_indices = @transform_5, window_bounds = array<i64: 72, 128>}, {transform_indices = @transform_6, window_bounds = array<i64: 1, 8, 128>}]} {
    %0 = arith.index_cast %arg0 : i32 to index
    %c0 = arith.constant 0 : index
    %1 = memref.load %arg1[%0, %c0] : memref<4x8xi32, #tpu.memory_space<smem>>
    %2 = arith.index_cast %1 : i32 to index
    %c0_0 = arith.constant 0 : index
    %3 = vector.load %arg4[%2, %c0_0] : memref<96x32xf32, #tpu.memory_space<vmem>>, vector<1x32xf32>
    %c0_1 = arith.constant 0 : index
    %c0_2 = arith.constant 0 : index
    %4 = vector.load %arg10[%c0_1, %c0_2] : memref<8x32xf32, #tpu.memory_space<vmem>>, vector<1x32xf32>
    tpu.vector_store %arg10[%c0_1, %c0_2], %3 {strides = array<i32>} : memref<8x32xf32, #tpu.memory_space<vmem>>, vector<1x32xf32>,
    %5 = arith.index_cast %arg0 : i32 to index
    %c1 = arith.constant 1 : index
    %6 = memref.load %arg1[%5, %c1] : memref<4x8xi32, #tpu.memory_space<smem>>
    %7 = arith.index_cast %6 : i32 to index
    %c0_3 = arith.constant 0 : index
    %8 = vector.load %arg4[%7, %c0_3] : memref<96x32xf32, #tpu.memory_space<vmem>>, vector<1x32xf32>
    %c1_4 = arith.constant 1 : index
    %c0_5 = arith.constant 0 : index
    %9 = vector.load %arg10[%c1_4, %c0_5] : memref<8x32xf32, #tpu.memory_space<vmem>>, vector<1x32xf32>
    tpu.vector_store %arg10[%c1_4, %c0_5], %8 {strides = array<i32>} : memref<8x32xf32, #tpu.memory_space<vmem>>, vector<1x32xf32>,
    %10 = arith.index_cast %arg0 : i32 to index
    %c2 = arith.constant 2 : index
    %11 = memref.load %arg1[%10, %c2] : memref<4x8xi32, #tpu.memory_space<smem>>
    %12 = arith.index_cast %11 : i32 to index
    %c0_6 = arith.constant 0 : index
    %13 = vector.load %arg4[%12, %c0_6] : memref<96x32xf32, #tpu.memory_space<vmem>>, vector<1x32xf32>
    %c2_7 = arith.constant 2 : index
    %c0_8 = arith.constant 0 : index
    %14 = vector.load %arg10[%c2_7, %c0_8] : memref<8x32xf32, #tpu.memory_space<vmem>>, vector<1x32xf32>
    tpu.vector_store %arg10[%c2_7, %c0_8], %13 {strides = array<i32>} : memref<8x32xf32, #tpu.memory_space<vmem>>, vector<1x32xf32>,
    %15 = arith.index_cast %arg0 : i32 to index
    %c3 = arith.constant 3 : index
    %16 = memref.load %arg1[%15, %c3] : memref<4x8xi32, #tpu.memory_space<smem>>
    %17 = arith.index_cast %16 : i32 to index
    %c0_9 = arith.constant 0 : index
    %18 = vector.load %arg4[%17, %c0_9] : memref<96x32xf32, #tpu.memory_space<vmem>>, vector<1x32xf32>
    %c3_10 = arith.constant 3 : index
    %c0_11 = arith.constant 0 : index
    %19 = vector.load %arg10[%c3_10, %c0_11] : memref<8x32xf32, #tpu.memory_space<vmem>>, vector<1x32xf32>
    tpu.vector_store %arg10[%c3_10, %c0_11], %18 {strides = array<i32>} : memref<8x32xf32, #tpu.memory_space<vmem>>, vector<1x32xf32>,
    %20 = arith.index_cast %arg0 : i32 to index
    %c4 = arith.constant 4 : index
    %21 = memref.load %arg1[%20, %c4] : memref<4x8xi32, #tpu.memory_space<smem>>
    %22 = arith.index_cast %21 : i32 to index
    %c0_12 = arith.constant 0 : index
    %23 = vector.load %arg4[%22, %c0_12] : memref<96x32xf32, #tpu.memory_space<vmem>>, vector<1x32xf32>
    %c4_13 = arith.constant 4 : index
    %c0_14 = arith.constant 0 : index
    %24 = vector.load %arg10[%c4_13, %c0_14] : memref<8x32xf32, #tpu.memory_space<vmem>>, vector<1x32xf32>
    tpu.vector_store %arg10[%c4_13, %c0_14], %23 {strides = array<i32>} : memref<8x32xf32, #tpu.memory_space<vmem>>, vector<1x32xf32>,
    %25 = arith.index_cast %arg0 : i32 to index
    %c5 = arith.constant 5 : index
    %26 = memref.load %arg1[%25, %c5] : memref<4x8xi32, #tpu.memory_space<smem>>
    %27 = arith.index_cast %26 : i32 to index
    %c0_15 = arith.constant 0 : index
    %28 = vector.load %arg4[%27, %c0_15] : memref<96x32xf32, #tpu.memory_space<vmem>>, vector<1x32xf32>
    %c5_16 = arith.constant 5 : index
    %c0_17 = arith.constant 0 : index
    %29 = vector.load %arg10[%c5_16, %c0_17] : memref<8x32xf32, #tpu.memory_space<vmem>>, vector<1x32xf32>
    tpu.vector_store %arg10[%c5_16, %c0_17], %28 {strides = array<i32>} : memref<8x32xf32, #tpu.memory_space<vmem>>, vector<1x32xf32>,
    %30 = arith.index_cast %arg0 : i32 to index
    %c6 = arith.constant 6 : index
    %31 = memref.load %arg1[%30, %c6] : memref<4x8xi32, #tpu.memory_space<smem>>
    %32 = arith.index_cast %31 : i32 to index
    %c0_18 = arith.constant 0 : index
    %33 = vector.load %arg4[%32, %c0_18] : memref<96x32xf32, #tpu.memory_space<vmem>>, vector<1x32xf32>
    %c6_19 = arith.constant 6 : index
    %c0_20 = arith.constant 0 : index
    %34 = vector.load %arg10[%c6_19, %c0_20] : memref<8x32xf32, #tpu.memory_space<vmem>>, vector<1x32xf32>
    tpu.vector_store %arg10[%c6_19, %c0_20], %33 {strides = array<i32>} : memref<8x32xf32, #tpu.memory_space<vmem>>, vector<1x32xf32>,
    %35 = arith.index_cast %arg0 : i32 to index
    %c7 = arith.constant 7 : index
    %36 = memref.load %arg1[%35, %c7] : memref<4x8xi32, #tpu.memory_space<smem>>
    %37 = arith.index_cast %36 : i32 to index
    %c0_21 = arith.constant 0 : index
    %38 = vector.load %arg4[%37, %c0_21] : memref<96x32xf32, #tpu.memory_space<vmem>>, vector<1x32xf32>
    %c7_22 = arith.constant 7 : index
    %c0_23 = arith.constant 0 : index
    %39 = vector.load %arg10[%c7_22, %c0_23] : memref<8x32xf32, #tpu.memory_space<vmem>>, vector<1x32xf32>
    tpu.vector_store %arg10[%c7_22, %c0_23], %38 {strides = array<i32>} : memref<8x32xf32, #tpu.memory_space<vmem>>, vector<1x32xf32>,
    %c0_24 = arith.constant 0 : index
    %c0_25 = arith.constant 0 : index
    %40 = vector.load %arg10[%c0_24, %c0_25] : memref<8x32xf32, #tpu.memory_space<vmem>>, vector<8x32xf32>
    %c64 = arith.constant 64 : index
    %c0_26 = arith.constant 0 : index
    %41 = vector.load %arg4[%c64, %c0_26] : memref<96x32xf32, #tpu.memory_space<vmem>>, vector<8x32xf32>
    %42 = arith.addf %40, %41 : vector<8x32xf32>
    %c72 = arith.constant 72 : index
    %c0_27 = arith.constant 0 : index
    %43 = vector.load %arg4[%c72, %c0_27] : memref<96x32xf32, #tpu.memory_space<vmem>>, vector<1x32xf32>
    %44 = vector.broadcast %43 : vector<1x32xf32> to vector<8x32xf32>
    %45 = arith.addf %42, %44 : vector<8x32xf32>
    %c80 = arith.constant 80 : index
    %c0_28 = arith.constant 0 : index
    %46 = vector.load %arg4[%c80, %c0_28] : memref<96x32xf32, #tpu.memory_space<vmem>>, vector<1x32xf32>
    %c88 = arith.constant 88 : index
    %c0_29 = arith.constant 0 : index
    %47 = vector.load %arg4[%c88, %c0_29] : memref<96x32xf32, #tpu.memory_space<vmem>>, vector<1x32xf32>
    %cst = arith.constant dense<0.000000e+00> : vector<8xf32>
    %48 = vector.multi_reduction <add>, %45, %cst [1] : vector<8x32xf32> to vector<8xf32>
    %49 = vector.shape_cast %48 : vector<8xf32> to vector<8x1xf32>
    %cst_30 = arith.constant 3.200000e+01 : f32
    %50 = vector.broadcast %cst_30 : f32 to vector<8x1xf32>
    %51 = arith.divf %49, %50 : vector<8x1xf32>
    %52 = vector.broadcast %51 : vector<8x1xf32> to vector<8x32xf32>
    %53 = arith.subf %45, %52 : vector<8x32xf32>
    %54 = arith.mulf %53, %53 : vector<8x32xf32>
    %cst_31 = arith.constant dense<0.000000e+00> : vector<8xf32>
    %55 = vector.multi_reduction <add>, %54, %cst_31 [1] : vector<8x32xf32> to vector<8xf32>
    %56 = vector.shape_cast %55 : vector<8xf32> to vector<8x1xf32>
    %cst_32 = arith.constant 3.200000e+01 : f32
    %57 = vector.broadcast %cst_32 : f32 to vector<8x1xf32>
    %58 = arith.divf %56, %57 : vector<8x1xf32>
    %59 = vector.broadcast %51 : vector<8x1xf32> to vector<8x32xf32>
    %60 = arith.subf %45, %59 : vector<8x32xf32>
    %cst_33 = arith.constant 9.99999996E-13 : f32
    %61 = vector.broadcast %cst_33 : f32 to vector<8x1xf32>
    %62 = arith.addf %58, %61 : vector<8x1xf32>
    %63 = math.rsqrt %62 : vector<8x1xf32>
    %64 = vector.broadcast %63 : vector<8x1xf32> to vector<8x32xf32>
    %65 = arith.mulf %60, %64 : vector<8x32xf32>
    %66 = vector.broadcast %46 : vector<1x32xf32> to vector<8x32xf32>
    %67 = arith.mulf %65, %66 : vector<8x32xf32>
    %68 = vector.broadcast %47 : vector<1x32xf32> to vector<8x32xf32>
    %69 = arith.addf %67, %68 : vector<8x32xf32>
    %c0_34 = arith.constant 0 : index
    %c0_35 = arith.constant 0 : index
    %c0_36 = arith.constant 0 : index
    %70 = vector.load %arg3[%c0_34, %c0_35, %c0_36] : memref<1x1x8xf32, #tpu.memory_space<vmem>>, vector<1x1x8xf32>
    %71 = vector.shape_cast %70 : vector<1x1x8xf32> to vector<1x8xf32>
    %cst_37 = arith.constant 1.000000e+00 : f32
    %72 = vector.broadcast %cst_37 : f32 to vector<1x8xf32>
    %73 = arith.subf %72, %71 : vector<1x8xf32>
    %cst_38 = arith.constant -1.000000e+09 : f32
    %74 = vector.broadcast %cst_38 : f32 to vector<1x8xf32>
    %75 = arith.mulf %73, %74 : vector<1x8xf32>
    %c0_39 = arith.constant 0 : index
    %c0_40 = arith.constant 0 : index
    %c0_41 = arith.constant 0 : index
    %76 = vector.load %arg5[%c0_39, %c0_40, %c0_41] : memref<2x32x384xf32, #tpu.memory_space<vmem>>, vector<1x32x96xf32>
    %77 = vector.shape_cast %76 : vector<1x32x96xf32> to vector<32x96xf32>
    %c0_42 = arith.constant 0 : index
    %c0_43 = arith.constant 0 : index
    %c128 = arith.constant 128 : index
    %78 = vector.load %arg5[%c0_42, %c0_43, %c128] : memref<2x32x384xf32, #tpu.memory_space<vmem>>, vector<1x32x32xf32>
    %79 = vector.shape_cast %78 : vector<1x32x32xf32> to vector<32x32xf32>
    %c0_44 = arith.constant 0 : index
    %c0_45 = arith.constant 0 : index
    %c256 = arith.constant 256 : index
    %80 = vector.load %arg5[%c0_44, %c0_45, %c256] : memref<2x32x384xf32, #tpu.memory_space<vmem>>, vector<1x32x64xf32>
    %81 = vector.shape_cast %80 : vector<1x32x64xf32> to vector<32x64xf32>
    %cst_46 = arith.constant dense<0.000000e+00> : vector<8x96xf32>
    %82 = tpu.matmul %69, %77, %cst_46 {dimension_numbers = #tpu.dot_dimension_numbers<[1], [0], [0], [1], [0, 0, 1, 1], [], []>} : vector<8x32xf32>, vector<32x96xf32>, vector<8x96xf32> -> vector<8x96xf32>
    %c0_47 = arith.constant 0 : index
    %c0_48 = arith.constant 0 : index
    %c0_49 = arith.constant 0 : index
    %83 = vector.load %arg7[%c0_47, %c0_48, %c0_49] : memref<2x8x128xf32, #tpu.memory_space<vmem>>, vector<1x1x96xf32>
    %84 = vector.shape_cast %83 : vector<1x1x96xf32> to vector<1x96xf32>
    %85 = vector.broadcast %84 : vector<1x96xf32> to vector<8x96xf32>
    %86 = arith.addf %82, %85 : vector<8x96xf32>
    %cst_50 = arith.constant 0.000000e+00 : f32
    %87 = vector.broadcast %cst_50 : f32 to vector<8x32xf32>
    %88 = vector.extract_strided_slice %86 {offsets = [0, 0], sizes = [8, 16], strides = [1, 1]} : vector<8x96xf32> to vector<8x16xf32>
    %cst_51 = arith.constant 2.500000e-01 : f32
    %89 = vector.broadcast %cst_51 : f32 to vector<8x16xf32>
    %90 = arith.mulf %88, %89 : vector<8x16xf32>
    %91 = vector.extract_strided_slice %86 {offsets = [0, 32], sizes = [8, 16], strides = [1, 1]} : vector<8x96xf32> to vector<8x16xf32>
    %92 = vector.extract_strided_slice %86 {offsets = [0, 64], sizes = [8, 16], strides = [1, 1]} : vector<8x96xf32> to vector<8x16xf32>
    %cst_52 = arith.constant dense<0.000000e+00> : vector<8x8xf32>
    %93 = tpu.matmul %90, %91, %cst_52 {dimension_numbers = #tpu.dot_dimension_numbers<[1], [1], [0], [0], [0, 0, 1, 0], [], []>} : vector<8x16xf32>, vector<8x16xf32>, vector<8x8xf32> -> vector<8x8xf32>
    %94 = vector.broadcast %75 : vector<1x8xf32> to vector<8x8xf32>
    %95 = arith.addf %93, %94 : vector<8x8xf32>
    %cst_53 = arith.constant dense<0xFF800000> : vector<8xf32>
    %96 = vector.multi_reduction <maximumf>, %95, %cst_53 [1] : vector<8x8xf32> to vector<8xf32>
    %97 = vector.shape_cast %96 : vector<8xf32> to vector<8x1xf32>
    %98 = vector.broadcast %97 : vector<8x1xf32> to vector<8x8xf32>
    %99 = arith.subf %95, %98 : vector<8x8xf32>
    %100 = math.exp %99 : vector<8x8xf32>
    %cst_54 = arith.constant dense<0.000000e+00> : vector<8xf32>
    %101 = vector.multi_reduction <add>, %100, %cst_54 [1] : vector<8x8xf32> to vector<8xf32>
    %102 = vector.shape_cast %101 : vector<8xf32> to vector<8x1xf32>
    %103 = vector.broadcast %102 : vector<8x1xf32> to vector<8x8xf32>
    %104 = arith.divf %100, %103 : vector<8x8xf32>
    %cst_55 = arith.constant dense<0.000000e+00> : vector<8x16xf32>
    %105 = tpu.matmul %104, %92, %cst_55 {dimension_numbers = #tpu.dot_dimension_numbers<[1], [0], [0], [1], [0, 0, 1, 1], [], []>} : vector<8x8xf32>, vector<8x16xf32>, vector<8x16xf32> -> vector<8x16xf32>
    %106 = vector.extract_strided_slice %79 {offsets = [0, 0], sizes = [16, 32], strides = [1, 1]} : vector<32x32xf32> to vector<16x32xf32>
    %cst_56 = arith.constant dense<0.000000e+00> : vector<8x32xf32>
    %107 = tpu.matmul %105, %106, %cst_56 {dimension_numbers = #tpu.dot_dimension_numbers<[1], [0], [0], [1], [0, 0, 1, 1], [], []>} : vector<8x16xf32>, vector<16x32xf32>, vector<8x32xf32> -> vector<8x32xf32>
    %108 = arith.addf %87, %107 : vector<8x32xf32>
    %109 = vector.extract_strided_slice %86 {offsets = [0, 16], sizes = [8, 16], strides = [1, 1]} : vector<8x96xf32> to vector<8x16xf32>
    %cst_57 = arith.constant 2.500000e-01 : f32
    %110 = vector.broadcast %cst_57 : f32 to vector<8x16xf32>
    %111 = arith.mulf %109, %110 : vector<8x16xf32>
    %112 = vector.extract_strided_slice %86 {offsets = [0, 48], sizes = [8, 16], strides = [1, 1]} : vector<8x96xf32> to vector<8x16xf32>
    %113 = vector.extract_strided_slice %86 {offsets = [0, 80], sizes = [8, 16], strides = [1, 1]} : vector<8x96xf32> to vector<8x16xf32>
    %cst_58 = arith.constant dense<0.000000e+00> : vector<8x8xf32>
    %114 = tpu.matmul %111, %112, %cst_58 {dimension_numbers = #tpu.dot_dimension_numbers<[1], [1], [0], [0], [0, 0, 1, 0], [], []>} : vector<8x16xf32>, vector<8x16xf32>, vector<8x8xf32> -> vector<8x8xf32>
    %115 = vector.broadcast %75 : vector<1x8xf32> to vector<8x8xf32>
    %116 = arith.addf %114, %115 : vector<8x8xf32>
    %cst_59 = arith.constant dense<0xFF800000> : vector<8xf32>
    %117 = vector.multi_reduction <maximumf>, %116, %cst_59 [1] : vector<8x8xf32> to vector<8xf32>
    %118 = vector.shape_cast %117 : vector<8xf32> to vector<8x1xf32>
    %119 = vector.broadcast %118 : vector<8x1xf32> to vector<8x8xf32>
    %120 = arith.subf %116, %119 : vector<8x8xf32>
    %121 = math.exp %120 : vector<8x8xf32>
    %cst_60 = arith.constant dense<0.000000e+00> : vector<8xf32>
    %122 = vector.multi_reduction <add>, %121, %cst_60 [1] : vector<8x8xf32> to vector<8xf32>
    %123 = vector.shape_cast %122 : vector<8xf32> to vector<8x1xf32>
    %124 = vector.broadcast %123 : vector<8x1xf32> to vector<8x8xf32>
    %125 = arith.divf %121, %124 : vector<8x8xf32>
    %cst_61 = arith.constant dense<0.000000e+00> : vector<8x16xf32>
    %126 = tpu.matmul %125, %113, %cst_61 {dimension_numbers = #tpu.dot_dimension_numbers<[1], [0], [0], [1], [0, 0, 1, 1], [], []>} : vector<8x8xf32>, vector<8x16xf32>, vector<8x16xf32> -> vector<8x16xf32>
    %127 = vector.extract_strided_slice %79 {offsets = [16, 0], sizes = [16, 32], strides = [1, 1]} : vector<32x32xf32> to vector<16x32xf32>
    %cst_62 = arith.constant dense<0.000000e+00> : vector<8x32xf32>
    %128 = tpu.matmul %126, %127, %cst_62 {dimension_numbers = #tpu.dot_dimension_numbers<[1], [0], [0], [1], [0, 0, 1, 1], [], []>} : vector<8x16xf32>, vector<16x32xf32>, vector<8x32xf32> -> vector<8x32xf32>
    %129 = arith.addf %108, %128 : vector<8x32xf32>
    %c0_63 = arith.constant 0 : index
    %c1_64 = arith.constant 1 : index
    %c0_65 = arith.constant 0 : index
    %130 = vector.load %arg7[%c0_63, %c1_64, %c0_65] : memref<2x8x128xf32, #tpu.memory_space<vmem>>, vector<1x1x32xf32>
    %131 = vector.shape_cast %130 : vector<1x1x32xf32> to vector<1x32xf32>
    %132 = vector.broadcast %131 : vector<1x32xf32> to vector<8x32xf32>
    %133 = arith.addf %129, %132 : vector<8x32xf32>
    %134 = arith.addf %133, %69 : vector<8x32xf32>
    %c0_66 = arith.constant 0 : index
    %c2_67 = arith.constant 2 : index
    %c0_68 = arith.constant 0 : index
    %135 = vector.load %arg7[%c0_66, %c2_67, %c0_68] : memref<2x8x128xf32, #tpu.memory_space<vmem>>, vector<1x1x32xf32>
    %136 = vector.shape_cast %135 : vector<1x1x32xf32> to vector<1x32xf32>
    %c0_69 = arith.constant 0 : index
    %c3_70 = arith.constant 3 : index
    %c0_71 = arith.constant 0 : index
    %137 = vector.load %arg7[%c0_69, %c3_70, %c0_71] : memref<2x8x128xf32, #tpu.memory_space<vmem>>, vector<1x1x32xf32>
    %138 = vector.shape_cast %137 : vector<1x1x32xf32> to vector<1x32xf32>
    %cst_72 = arith.constant dense<0.000000e+00> : vector<8xf32>
    %139 = vector.multi_reduction <add>, %134, %cst_72 [1] : vector<8x32xf32> to vector<8xf32>
    %140 = vector.shape_cast %139 : vector<8xf32> to vector<8x1xf32>
    %cst_73 = arith.constant 3.200000e+01 : f32
    %141 = vector.broadcast %cst_73 : f32 to vector<8x1xf32>
    %142 = arith.divf %140, %141 : vector<8x1xf32>
    %143 = vector.broadcast %142 : vector<8x1xf32> to vector<8x32xf32>
    %144 = arith.subf %134, %143 : vector<8x32xf32>
    %145 = arith.mulf %144, %144 : vector<8x32xf32>
    %cst_74 = arith.constant dense<0.000000e+00> : vector<8xf32>
    %146 = vector.multi_reduction <add>, %145, %cst_74 [1] : vector<8x32xf32> to vector<8xf32>
    %147 = vector.shape_cast %146 : vector<8xf32> to vector<8x1xf32>
    %cst_75 = arith.constant 3.200000e+01 : f32
    %148 = vector.broadcast %cst_75 : f32 to vector<8x1xf32>
    %149 = arith.divf %147, %148 : vector<8x1xf32>
    %150 = vector.broadcast %142 : vector<8x1xf32> to vector<8x32xf32>
    %151 = arith.subf %134, %150 : vector<8x32xf32>
    %cst_76 = arith.constant 9.99999996E-13 : f32
    %152 = vector.broadcast %cst_76 : f32 to vector<8x1xf32>
    %153 = arith.addf %149, %152 : vector<8x1xf32>
    %154 = math.rsqrt %153 : vector<8x1xf32>
    %155 = vector.broadcast %154 : vector<8x1xf32> to vector<8x32xf32>
    %156 = arith.mulf %151, %155 : vector<8x32xf32>
    %157 = vector.broadcast %136 : vector<1x32xf32> to vector<8x32xf32>
    %158 = arith.mulf %156, %157 : vector<8x32xf32>
    %159 = vector.broadcast %138 : vector<1x32xf32> to vector<8x32xf32>
    %160 = arith.addf %158, %159 : vector<8x32xf32>
    %cst_77 = arith.constant dense<0.000000e+00> : vector<8x64xf32>
    %161 = tpu.matmul %160, %81, %cst_77 {dimension_numbers = #tpu.dot_dimension_numbers<[1], [0], [0], [1], [0, 0, 1, 1], [], []>} : vector<8x32xf32>, vector<32x64xf32>, vector<8x64xf32> -> vector<8x64xf32>
    %c0_78 = arith.constant 0 : index
    %c4_79 = arith.constant 4 : index
    %c0_80 = arith.constant 0 : index
    %162 = vector.load %arg7[%c0_78, %c4_79, %c0_80] : memref<2x8x128xf32, #tpu.memory_space<vmem>>, vector<1x1x64xf32>
    %163 = vector.shape_cast %162 : vector<1x1x64xf32> to vector<1x64xf32>
    %164 = vector.broadcast %163 : vector<1x64xf32> to vector<8x64xf32>
    %165 = arith.addf %161, %164 : vector<8x64xf32>
    %cst_81 = arith.constant 5.000000e-01 : f32
    %166 = vector.broadcast %cst_81 : f32 to vector<8x64xf32>
    %167 = arith.mulf %166, %165 : vector<8x64xf32>
    %cst_82 = arith.constant 4.471500e-02 : f32
    %168 = vector.broadcast %cst_82 : f32 to vector<8x64xf32>
    %169 = arith.mulf %168, %165 : vector<8x64xf32>
    %170 = arith.mulf %169, %165 : vector<8x64xf32>
    %171 = arith.mulf %170, %165 : vector<8x64xf32>
    %172 = arith.addf %165, %171 : vector<8x64xf32>
    %cst_83 = arith.constant 0.797884583 : f32
    %173 = vector.broadcast %cst_83 : f32 to vector<8x64xf32>
    %174 = arith.mulf %173, %172 : vector<8x64xf32>
    %175 = math.tanh %174 : vector<8x64xf32>
    %cst_84 = arith.constant 1.000000e+00 : f32
    %176 = vector.broadcast %cst_84 : f32 to vector<8x64xf32>
    %177 = arith.addf %176, %175 : vector<8x64xf32>
    %178 = arith.mulf %167, %177 : vector<8x64xf32>
    %c0_85 = arith.constant 0 : index
    %c0_86 = arith.constant 0 : index
    %c0_87 = arith.constant 0 : index
    %179 = vector.load %arg6[%c0_85, %c0_86, %c0_87] : memref<2x64x32xf32, #tpu.memory_space<vmem>>, vector<1x64x32xf32>
    %180 = vector.shape_cast %179 : vector<1x64x32xf32> to vector<64x32xf32>
    %cst_88 = arith.constant dense<0.000000e+00> : vector<8x32xf32>
    %181 = tpu.matmul %178, %180, %cst_88 {dimension_numbers = #tpu.dot_dimension_numbers<[1], [0], [0], [1], [0, 0, 1, 1], [], []>} : vector<8x64xf32>, vector<64x32xf32>, vector<8x32xf32> -> vector<8x32xf32>
    %c0_89 = arith.constant 0 : index
    %c5_90 = arith.constant 5 : index
    %c0_91 = arith.constant 0 : index
    %182 = vector.load %arg7[%c0_89, %c5_90, %c0_91] : memref<2x8x128xf32, #tpu.memory_space<vmem>>, vector<1x1x32xf32>
    %183 = vector.shape_cast %182 : vector<1x1x32xf32> to vector<1x32xf32>
    %184 = vector.broadcast %183 : vector<1x32xf32> to vector<8x32xf32>
    %185 = arith.addf %181, %184 : vector<8x32xf32>
    %186 = arith.addf %185, %160 : vector<8x32xf32>
    %c0_92 = arith.constant 0 : index
    %c6_93 = arith.constant 6 : index
    %c0_94 = arith.constant 0 : index
    %187 = vector.load %arg7[%c0_92, %c6_93, %c0_94] : memref<2x8x128xf32, #tpu.memory_space<vmem>>, vector<1x1x32xf32>
    %188 = vector.shape_cast %187 : vector<1x1x32xf32> to vector<1x32xf32>
    %c0_95 = arith.constant 0 : index
    %c7_96 = arith.constant 7 : index
    %c0_97 = arith.constant 0 : index
    %189 = vector.load %arg7[%c0_95, %c7_96, %c0_97] : memref<2x8x128xf32, #tpu.memory_space<vmem>>, vector<1x1x32xf32>
    %190 = vector.shape_cast %189 : vector<1x1x32xf32> to vector<1x32xf32>
    %cst_98 = arith.constant dense<0.000000e+00> : vector<8xf32>
    %191 = vector.multi_reduction <add>, %186, %cst_98 [1] : vector<8x32xf32> to vector<8xf32>
    %192 = vector.shape_cast %191 : vector<8xf32> to vector<8x1xf32>
    %cst_99 = arith.constant 3.200000e+01 : f32
    %193 = vector.broadcast %cst_99 : f32 to vector<8x1xf32>
    %194 = arith.divf %192, %193 : vector<8x1xf32>
    %195 = vector.broadcast %194 : vector<8x1xf32> to vector<8x32xf32>
    %196 = arith.subf %186, %195 : vector<8x32xf32>
    %197 = arith.mulf %196, %196 : vector<8x32xf32>
    %cst_100 = arith.constant dense<0.000000e+00> : vector<8xf32>
    %198 = vector.multi_reduction <add>, %197, %cst_100 [1] : vector<8x32xf32> to vector<8xf32>
    %199 = vector.shape_cast %198 : vector<8xf32> to vector<8x1xf32>
    %cst_101 = arith.constant 3.200000e+01 : f32
    %200 = vector.broadcast %cst_101 : f32 to vector<8x1xf32>
    %201 = arith.divf %199, %200 : vector<8x1xf32>
    %202 = vector.broadcast %194 : vector<8x1xf32> to vector<8x32xf32>
    %203 = arith.subf %186, %202 : vector<8x32xf32>
    %cst_102 = arith.constant 9.99999996E-13 : f32
    %204 = vector.broadcast %cst_102 : f32 to vector<8x1xf32>
    %205 = arith.addf %201, %204 : vector<8x1xf32>
    %206 = math.rsqrt %205 : vector<8x1xf32>
    %207 = vector.broadcast %206 : vector<8x1xf32> to vector<8x32xf32>
    %208 = arith.mulf %203, %207 : vector<8x32xf32>
    %209 = vector.broadcast %188 : vector<1x32xf32> to vector<8x32xf32>
    %210 = arith.mulf %208, %209 : vector<8x32xf32>
    %211 = vector.broadcast %190 : vector<1x32xf32> to vector<8x32xf32>
    %212 = arith.addf %210, %211 : vector<8x32xf32>
    %c1_103 = arith.constant 1 : index
    %c0_104 = arith.constant 0 : index
    %c0_105 = arith.constant 0 : index
    %213 = vector.load %arg5[%c1_103, %c0_104, %c0_105] : memref<2x32x384xf32, #tpu.memory_space<vmem>>, vector<1x32x96xf32>
    %214 = vector.shape_cast %213 : vector<1x32x96xf32> to vector<32x96xf32>
    %c1_106 = arith.constant 1 : index
    %c0_107 = arith.constant 0 : index
    %c128_108 = arith.constant 128 : index
    %215 = vector.load %arg5[%c1_106, %c0_107, %c128_108] : memref<2x32x384xf32, #tpu.memory_space<vmem>>, vector<1x32x32xf32>
    %216 = vector.shape_cast %215 : vector<1x32x32xf32> to vector<32x32xf32>
    %c1_109 = arith.constant 1 : index
    %c0_110 = arith.constant 0 : index
    %c256_111 = arith.constant 256 : index
    %217 = vector.load %arg5[%c1_109, %c0_110, %c256_111] : memref<2x32x384xf32, #tpu.memory_space<vmem>>, vector<1x32x64xf32>
    %218 = vector.shape_cast %217 : vector<1x32x64xf32> to vector<32x64xf32>
    %cst_112 = arith.constant dense<0.000000e+00> : vector<8x96xf32>
    %219 = tpu.matmul %212, %214, %cst_112 {dimension_numbers = #tpu.dot_dimension_numbers<[1], [0], [0], [1], [0, 0, 1, 1], [], []>} : vector<8x32xf32>, vector<32x96xf32>, vector<8x96xf32> -> vector<8x96xf32>
    %c1_113 = arith.constant 1 : index
    %c0_114 = arith.constant 0 : index
    %c0_115 = arith.constant 0 : index
    %220 = vector.load %arg7[%c1_113, %c0_114, %c0_115] : memref<2x8x128xf32, #tpu.memory_space<vmem>>, vector<1x1x96xf32>
    %221 = vector.shape_cast %220 : vector<1x1x96xf32> to vector<1x96xf32>
    %222 = vector.broadcast %221 : vector<1x96xf32> to vector<8x96xf32>
    %223 = arith.addf %219, %222 : vector<8x96xf32>
    %cst_116 = arith.constant 0.000000e+00 : f32
    %224 = vector.broadcast %cst_116 : f32 to vector<8x32xf32>
    %225 = vector.extract_strided_slice %223 {offsets = [0, 0], sizes = [8, 16], strides = [1, 1]} : vector<8x96xf32> to vector<8x16xf32>
    %cst_117 = arith.constant 2.500000e-01 : f32
    %226 = vector.broadcast %cst_117 : f32 to vector<8x16xf32>
    %227 = arith.mulf %225, %226 : vector<8x16xf32>
    %228 = vector.extract_strided_slice %223 {offsets = [0, 32], sizes = [8, 16], strides = [1, 1]} : vector<8x96xf32> to vector<8x16xf32>
    %229 = vector.extract_strided_slice %223 {offsets = [0, 64], sizes = [8, 16], strides = [1, 1]} : vector<8x96xf32> to vector<8x16xf32>
    %cst_118 = arith.constant dense<0.000000e+00> : vector<8x8xf32>
    %230 = tpu.matmul %227, %228, %cst_118 {dimension_numbers = #tpu.dot_dimension_numbers<[1], [1], [0], [0], [0, 0, 1, 0], [], []>} : vector<8x16xf32>, vector<8x16xf32>, vector<8x8xf32> -> vector<8x8xf32>
    %231 = vector.broadcast %75 : vector<1x8xf32> to vector<8x8xf32>
    %232 = arith.addf %230, %231 : vector<8x8xf32>
    %cst_119 = arith.constant dense<0xFF800000> : vector<8xf32>
    %233 = vector.multi_reduction <maximumf>, %232, %cst_119 [1] : vector<8x8xf32> to vector<8xf32>
    %234 = vector.shape_cast %233 : vector<8xf32> to vector<8x1xf32>
    %235 = vector.broadcast %234 : vector<8x1xf32> to vector<8x8xf32>
    %236 = arith.subf %232, %235 : vector<8x8xf32>
    %237 = math.exp %236 : vector<8x8xf32>
    %cst_120 = arith.constant dense<0.000000e+00> : vector<8xf32>
    %238 = vector.multi_reduction <add>, %237, %cst_120 [1] : vector<8x8xf32> to vector<8xf32>
    %239 = vector.shape_cast %238 : vector<8xf32> to vector<8x1xf32>
    %240 = vector.broadcast %239 : vector<8x1xf32> to vector<8x8xf32>
    %241 = arith.divf %237, %240 : vector<8x8xf32>
    %cst_121 = arith.constant dense<0.000000e+00> : vector<8x16xf32>
    %242 = tpu.matmul %241, %229, %cst_121 {dimension_numbers = #tpu.dot_dimension_numbers<[1], [0], [0], [1], [0, 0, 1, 1], [], []>} : vector<8x8xf32>, vector<8x16xf32>, vector<8x16xf32> -> vector<8x16xf32>
    %243 = vector.extract_strided_slice %216 {offsets = [0, 0], sizes = [16, 32], strides = [1, 1]} : vector<32x32xf32> to vector<16x32xf32>
    %cst_122 = arith.constant dense<0.000000e+00> : vector<8x32xf32>
    %244 = tpu.matmul %242, %243, %cst_122 {dimension_numbers = #tpu.dot_dimension_numbers<[1], [0], [0], [1], [0, 0, 1, 1], [], []>} : vector<8x16xf32>, vector<16x32xf32>, vector<8x32xf32> -> vector<8x32xf32>
    %245 = arith.addf %224, %244 : vector<8x32xf32>
    %246 = vector.extract_strided_slice %223 {offsets = [0, 16], sizes = [8, 16], strides = [1, 1]} : vector<8x96xf32> to vector<8x16xf32>
    %cst_123 = arith.constant 2.500000e-01 : f32
    %247 = vector.broadcast %cst_123 : f32 to vector<8x16xf32>
    %248 = arith.mulf %246, %247 : vector<8x16xf32>
    %249 = vector.extract_strided_slice %223 {offsets = [0, 48], sizes = [8, 16], strides = [1, 1]} : vector<8x96xf32> to vector<8x16xf32>
    %250 = vector.extract_strided_slice %223 {offsets = [0, 80], sizes = [8, 16], strides = [1, 1]} : vector<8x96xf32> to vector<8x16xf32>
    %cst_124 = arith.constant dense<0.000000e+00> : vector<8x8xf32>
    %251 = tpu.matmul %248, %249, %cst_124 {dimension_numbers = #tpu.dot_dimension_numbers<[1], [1], [0], [0], [0, 0, 1, 0], [], []>} : vector<8x16xf32>, vector<8x16xf32>, vector<8x8xf32> -> vector<8x8xf32>
    %252 = vector.broadcast %75 : vector<1x8xf32> to vector<8x8xf32>
    %253 = arith.addf %251, %252 : vector<8x8xf32>
    %cst_125 = arith.constant dense<0xFF800000> : vector<8xf32>
    %254 = vector.multi_reduction <maximumf>, %253, %cst_125 [1] : vector<8x8xf32> to vector<8xf32>
    %255 = vector.shape_cast %254 : vector<8xf32> to vector<8x1xf32>
    %256 = vector.broadcast %255 : vector<8x1xf32> to vector<8x8xf32>
    %257 = arith.subf %253, %256 : vector<8x8xf32>
    %258 = math.exp %257 : vector<8x8xf32>
    %cst_126 = arith.constant dense<0.000000e+00> : vector<8xf32>
    %259 = vector.multi_reduction <add>, %258, %cst_126 [1] : vector<8x8xf32> to vector<8xf32>
    %260 = vector.shape_cast %259 : vector<8xf32> to vector<8x1xf32>
    %261 = vector.broadcast %260 : vector<8x1xf32> to vector<8x8xf32>
    %262 = arith.divf %258, %261 : vector<8x8xf32>
    %cst_127 = arith.constant dense<0.000000e+00> : vector<8x16xf32>
    %263 = tpu.matmul %262, %250, %cst_127 {dimension_numbers = #tpu.dot_dimension_numbers<[1], [0], [0], [1], [0, 0, 1, 1], [], []>} : vector<8x8xf32>, vector<8x16xf32>, vector<8x16xf32> -> vector<8x16xf32>
    %264 = vector.extract_strided_slice %216 {offsets = [16, 0], sizes = [16, 32], strides = [1, 1]} : vector<32x32xf32> to vector<16x32xf32>
    %cst_128 = arith.constant dense<0.000000e+00> : vector<8x32xf32>
    %265 = tpu.matmul %263, %264, %cst_128 {dimension_numbers = #tpu.dot_dimension_numbers<[1], [0], [0], [1], [0, 0, 1, 1], [], []>} : vector<8x16xf32>, vector<16x32xf32>, vector<8x32xf32> -> vector<8x32xf32>
    %266 = arith.addf %245, %265 : vector<8x32xf32>
    %c1_129 = arith.constant 1 : index
    %c1_130 = arith.constant 1 : index
    %c0_131 = arith.constant 0 : index
    %267 = vector.load %arg7[%c1_129, %c1_130, %c0_131] : memref<2x8x128xf32, #tpu.memory_space<vmem>>, vector<1x1x32xf32>
    %268 = vector.shape_cast %267 : vector<1x1x32xf32> to vector<1x32xf32>
    %269 = vector.broadcast %268 : vector<1x32xf32> to vector<8x32xf32>
    %270 = arith.addf %266, %269 : vector<8x32xf32>
    %271 = arith.addf %270, %212 : vector<8x32xf32>
    %c1_132 = arith.constant 1 : index
    %c2_133 = arith.constant 2 : index
    %c0_134 = arith.constant 0 : index
    %272 = vector.load %arg7[%c1_132, %c2_133, %c0_134] : memref<2x8x128xf32, #tpu.memory_space<vmem>>, vector<1x1x32xf32>
    %273 = vector.shape_cast %272 : vector<1x1x32xf32> to vector<1x32xf32>
    %c1_135 = arith.constant 1 : index
    %c3_136 = arith.constant 3 : index
    %c0_137 = arith.constant 0 : index
    %274 = vector.load %arg7[%c1_135, %c3_136, %c0_137] : memref<2x8x128xf32, #tpu.memory_space<vmem>>, vector<1x1x32xf32>
    %275 = vector.shape_cast %274 : vector<1x1x32xf32> to vector<1x32xf32>
    %cst_138 = arith.constant dense<0.000000e+00> : vector<8xf32>
    %276 = vector.multi_reduction <add>, %271, %cst_138 [1] : vector<8x32xf32> to vector<8xf32>
    %277 = vector.shape_cast %276 : vector<8xf32> to vector<8x1xf32>
    %cst_139 = arith.constant 3.200000e+01 : f32
    %278 = vector.broadcast %cst_139 : f32 to vector<8x1xf32>
    %279 = arith.divf %277, %278 : vector<8x1xf32>
    %280 = vector.broadcast %279 : vector<8x1xf32> to vector<8x32xf32>
    %281 = arith.subf %271, %280 : vector<8x32xf32>
    %282 = arith.mulf %281, %281 : vector<8x32xf32>
    %cst_140 = arith.constant dense<0.000000e+00> : vector<8xf32>
    %283 = vector.multi_reduction <add>, %282, %cst_140 [1] : vector<8x32xf32> to vector<8xf32>
    %284 = vector.shape_cast %283 : vector<8xf32> to vector<8x1xf32>
    %cst_141 = arith.constant 3.200000e+01 : f32
    %285 = vector.broadcast %cst_141 : f32 to vector<8x1xf32>
    %286 = arith.divf %284, %285 : vector<8x1xf32>
    %287 = vector.broadcast %279 : vector<8x1xf32> to vector<8x32xf32>
    %288 = arith.subf %271, %287 : vector<8x32xf32>
    %cst_142 = arith.constant 9.99999996E-13 : f32
    %289 = vector.broadcast %cst_142 : f32 to vector<8x1xf32>
    %290 = arith.addf %286, %289 : vector<8x1xf32>
    %291 = math.rsqrt %290 : vector<8x1xf32>
    %292 = vector.broadcast %291 : vector<8x1xf32> to vector<8x32xf32>
    %293 = arith.mulf %288, %292 : vector<8x32xf32>
    %294 = vector.broadcast %273 : vector<1x32xf32> to vector<8x32xf32>
    %295 = arith.mulf %293, %294 : vector<8x32xf32>
    %296 = vector.broadcast %275 : vector<1x32xf32> to vector<8x32xf32>
    %297 = arith.addf %295, %296 : vector<8x32xf32>
    %cst_143 = arith.constant dense<0.000000e+00> : vector<8x64xf32>
    %298 = tpu.matmul %297, %218, %cst_143 {dimension_numbers = #tpu.dot_dimension_numbers<[1], [0], [0], [1], [0, 0, 1, 1], [], []>} : vector<8x32xf32>, vector<32x64xf32>, vector<8x64xf32> -> vector<8x64xf32>
    %c1_144 = arith.constant 1 : index
    %c4_145 = arith.constant 4 : index
    %c0_146 = arith.constant 0 : index
    %299 = vector.load %arg7[%c1_144, %c4_145, %c0_146] : memref<2x8x128xf32, #tpu.memory_space<vmem>>, vector<1x1x64xf32>
    %300 = vector.shape_cast %299 : vector<1x1x64xf32> to vector<1x64xf32>
    %301 = vector.broadcast %300 : vector<1x64xf32> to vector<8x64xf32>
    %302 = arith.addf %298, %301 : vector<8x64xf32>
    %cst_147 = arith.constant 5.000000e-01 : f32
    %303 = vector.broadcast %cst_147 : f32 to vector<8x64xf32>
    %304 = arith.mulf %303, %302 : vector<8x64xf32>
    %cst_148 = arith.constant 4.471500e-02 : f32
    %305 = vector.broadcast %cst_148 : f32 to vector<8x64xf32>
    %306 = arith.mulf %305, %302 : vector<8x64xf32>
    %307 = arith.mulf %306, %302 : vector<8x64xf32>
    %308 = arith.mulf %307, %302 : vector<8x64xf32>
    %309 = arith.addf %302, %308 : vector<8x64xf32>
    %cst_149 = arith.constant 0.797884583 : f32
    %310 = vector.broadcast %cst_149 : f32 to vector<8x64xf32>
    %311 = arith.mulf %310, %309 : vector<8x64xf32>
    %312 = math.tanh %311 : vector<8x64xf32>
    %cst_150 = arith.constant 1.000000e+00 : f32
    %313 = vector.broadcast %cst_150 : f32 to vector<8x64xf32>
    %314 = arith.addf %313, %312 : vector<8x64xf32>
    %315 = arith.mulf %304, %314 : vector<8x64xf32>
    %c1_151 = arith.constant 1 : index
    %c0_152 = arith.constant 0 : index
    %c0_153 = arith.constant 0 : index
    %316 = vector.load %arg6[%c1_151, %c0_152, %c0_153] : memref<2x64x32xf32, #tpu.memory_space<vmem>>, vector<1x64x32xf32>
    %317 = vector.shape_cast %316 : vector<1x64x32xf32> to vector<64x32xf32>
    %cst_154 = arith.constant dense<0.000000e+00> : vector<8x32xf32>
    %318 = tpu.matmul %315, %317, %cst_154 {dimension_numbers = #tpu.dot_dimension_numbers<[1], [0], [0], [1], [0, 0, 1, 1], [], []>} : vector<8x64xf32>, vector<64x32xf32>, vector<8x32xf32> -> vector<8x32xf32>
    %c1_155 = arith.constant 1 : index
    %c5_156 = arith.constant 5 : index
    %c0_157 = arith.constant 0 : index
    %319 = vector.load %arg7[%c1_155, %c5_156, %c0_157] : memref<2x8x128xf32, #tpu.memory_space<vmem>>, vector<1x1x32xf32>
    %320 = vector.shape_cast %319 : vector<1x1x32xf32> to vector<1x32xf32>
    %321 = vector.broadcast %320 : vector<1x32xf32> to vector<8x32xf32>
    %322 = arith.addf %318, %321 : vector<8x32xf32>
    %323 = arith.addf %322, %297 : vector<8x32xf32>
    %c1_158 = arith.constant 1 : index
    %c6_159 = arith.constant 6 : index
    %c0_160 = arith.constant 0 : index
    %324 = vector.load %arg7[%c1_158, %c6_159, %c0_160] : memref<2x8x128xf32, #tpu.memory_space<vmem>>, vector<1x1x32xf32>
    %325 = vector.shape_cast %324 : vector<1x1x32xf32> to vector<1x32xf32>
    %c1_161 = arith.constant 1 : index
    %c7_162 = arith.constant 7 : index
    %c0_163 = arith.constant 0 : index
    %326 = vector.load %arg7[%c1_161, %c7_162, %c0_163] : memref<2x8x128xf32, #tpu.memory_space<vmem>>, vector<1x1x32xf32>
    %327 = vector.shape_cast %326 : vector<1x1x32xf32> to vector<1x32xf32>
    %cst_164 = arith.constant dense<0.000000e+00> : vector<8xf32>
    %328 = vector.multi_reduction <add>, %323, %cst_164 [1] : vector<8x32xf32> to vector<8xf32>
    %329 = vector.shape_cast %328 : vector<8xf32> to vector<8x1xf32>
    %cst_165 = arith.constant 3.200000e+01 : f32
    %330 = vector.broadcast %cst_165 : f32 to vector<8x1xf32>
    %331 = arith.divf %329, %330 : vector<8x1xf32>
    %332 = vector.broadcast %331 : vector<8x1xf32> to vector<8x32xf32>
    %333 = arith.subf %323, %332 : vector<8x32xf32>
    %334 = arith.mulf %333, %333 : vector<8x32xf32>
    %cst_166 = arith.constant dense<0.000000e+00> : vector<8xf32>
    %335 = vector.multi_reduction <add>, %334, %cst_166 [1] : vector<8x32xf32> to vector<8xf32>
    %336 = vector.shape_cast %335 : vector<8xf32> to vector<8x1xf32>
    %cst_167 = arith.constant 3.200000e+01 : f32
    %337 = vector.broadcast %cst_167 : f32 to vector<8x1xf32>
    %338 = arith.divf %336, %337 : vector<8x1xf32>
    %339 = vector.broadcast %331 : vector<8x1xf32> to vector<8x32xf32>
    %340 = arith.subf %323, %339 : vector<8x32xf32>
    %cst_168 = arith.constant 9.99999996E-13 : f32
    %341 = vector.broadcast %cst_168 : f32 to vector<8x1xf32>
    %342 = arith.addf %338, %341 : vector<8x1xf32>
    %343 = math.rsqrt %342 : vector<8x1xf32>
    %344 = vector.broadcast %343 : vector<8x1xf32> to vector<8x32xf32>
    %345 = arith.mulf %340, %344 : vector<8x32xf32>
    %346 = vector.broadcast %325 : vector<1x32xf32> to vector<8x32xf32>
    %347 = arith.mulf %345, %346 : vector<8x32xf32>
    %348 = vector.broadcast %327 : vector<1x32xf32> to vector<8x32xf32>
    %349 = arith.addf %347, %348 : vector<8x32xf32>
    %350 = arith.index_cast %arg0 : i32 to index
    %c0_169 = arith.constant 0 : index
    %351 = memref.load %arg2[%350, %c0_169] : memref<4x2xi32, #tpu.memory_space<smem>>
    %352 = arith.index_cast %arg0 : i32 to index
    %c1_170 = arith.constant 1 : index
    %353 = memref.load %arg2[%352, %c1_170] : memref<4x2xi32, #tpu.memory_space<smem>>
    %354 = tpu.iota {dimensions = array<i32: 0>} : vector<2x8xi32>
    %355 = tpu.iota {dimensions = array<i32: 1>} : vector<2x8xi32>
    %c0_i32 = arith.constant 0 : i32
    %356 = vector.broadcast %c0_i32 : i32 to vector<2x8xi32>
    %357 = arith.cmpi eq, %354, %356 : vector<2x8xi32>
    %358 = vector.broadcast %351 : i32 to vector<2x8xi32>
    %359 = vector.broadcast %353 : i32 to vector<2x8xi32>
    %360 = arith.select %357, %358, %359 : vector<2x8xi1>, vector<2x8xi32>
    %361 = arith.cmpi eq, %355, %360 : vector<2x8xi32>
    %362 = arith.extui %361 : vector<2x8xi1> to vector<2x8xi32>
    %363 = arith.sitofp %362 : vector<2x8xi32> to vector<2x8xf32>
    %cst_171 = arith.constant dense<0.000000e+00> : vector<2x32xf32>
    %364 = tpu.matmul %363, %349, %cst_171 {dimension_numbers = #tpu.dot_dimension_numbers<[1], [0], [0], [1], [0, 0, 1, 1], [], []>} : vector<2x8xf32>, vector<8x32xf32>, vector<2x32xf32> -> vector<2x32xf32>
    %365 = vector.extract_strided_slice %364 {offsets = [0, 0], sizes = [1, 32], strides = [1, 1]} : vector<2x32xf32> to vector<1x32xf32>
    %c0_172 = arith.constant 0 : index
    %c0_173 = arith.constant 0 : index
    %366 = vector.load %arg8[%c0_172, %c0_173] : memref<72x128xf32, #tpu.memory_space<vmem>>, vector<32x128xf32>
    %cst_174 = arith.constant dense<0.000000e+00> : vector<1x128xf32>
    %367 = tpu.matmul %365, %366, %cst_174 {dimension_numbers = #tpu.dot_dimension_numbers<[1], [0], [0], [1], [0, 0, 1, 1], [], []>} : vector<1x32xf32>, vector<32x128xf32>, vector<1x128xf32> -> vector<1x128xf32>
    %368 = vector.extract_strided_slice %364 {offsets = [1, 0], sizes = [1, 32], strides = [1, 1]} : vector<2x32xf32> to vector<1x32xf32>
    %c32 = arith.constant 32 : index
    %c0_175 = arith.constant 0 : index
    %369 = vector.load %arg8[%c32, %c0_175] : memref<72x128xf32, #tpu.memory_space<vmem>>, vector<32x128xf32>
    %cst_176 = arith.constant dense<0.000000e+00> : vector<1x128xf32>
    %370 = tpu.matmul %368, %369, %cst_176 {dimension_numbers = #tpu.dot_dimension_numbers<[1], [0], [0], [1], [0, 0, 1, 1], [], []>} : vector<1x32xf32>, vector<32x128xf32>, vector<1x128xf32> -> vector<1x128xf32>
    %371 = arith.addf %367, %370 : vector<1x128xf32>
    %c64_177 = arith.constant 64 : index
    %c0_178 = arith.constant 0 : index
    %372 = vector.load %arg8[%c64_177, %c0_178] : memref<72x128xf32, #tpu.memory_space<vmem>>, vector<1x128xf32>
    %373 = arith.addf %371, %372 : vector<1x128xf32>
    %374 = vector.shape_cast %373 : vector<1x128xf32> to vector<1x128xf32>
    %375 = vector.broadcast %374 : vector<1x128xf32> to vector<8x128xf32>
    %c0_179 = arith.constant 0 : index
    %c0_180 = arith.constant 0 : index
    %c0_181 = arith.constant 0 : index
    %376 = vector.load %arg9[%c0_179, %c0_180, %c0_181] : memref<1x8x128xf32, #tpu.memory_space<vmem>>, vector<1x8x128xf32>
    %377 = vector.shape_cast %376 : vector<1x8x128xf32> to vector<8x128xf32>
    %378 = vector.shape_cast %375 : vector<8x128xf32> to vector<1x8x128xf32>
    tpu.vector_store %arg9[%c0_179, %c0_180, %c0_181], %378 {strides = array<i32>} : memref<1x8x128xf32, #tpu.memory_space<vmem>>, vector<1x8x128xf32>,
    return
  }
  func.func @transform_0(%arg0: i32, %arg1: memref<4x8xi32, #tpu.memory_space<smem>>, %arg2: memref<4x2xi32, #tpu.memory_space<smem>>) -> (i32, i32, i32) {
    %c0_i32 = arith.constant 0 : i32
    %c0_i32_0 = arith.constant 0 : i32
    %c0_i32_1 = arith.constant 0 : i32
    return %arg0, %c0_i32, %c0_i32_0 : i32, i32, i32
  }
  func.func @transform_1(%arg0: i32, %arg1: memref<4x8xi32, #tpu.memory_space<smem>>, %arg2: memref<4x2xi32, #tpu.memory_space<smem>>) -> (i32, i32) {
    %c0_i32 = arith.constant 0 : i32
    %c0_i32_0 = arith.constant 0 : i32
    %c0_i32_1 = arith.constant 0 : i32
    return %c0_i32, %c0_i32_0 : i32, i32
  }
  func.func @transform_2(%arg0: i32, %arg1: memref<4x8xi32, #tpu.memory_space<smem>>, %arg2: memref<4x2xi32, #tpu.memory_space<smem>>) -> (i32, i32, i32) {
    %c0_i32 = arith.constant 0 : i32
    %c0_i32_0 = arith.constant 0 : i32
    %c0_i32_1 = arith.constant 0 : i32
    %c0_i32_2 = arith.constant 0 : i32
    return %c0_i32, %c0_i32_0, %c0_i32_1 : i32, i32, i32
  }
  func.func @transform_3(%arg0: i32, %arg1: memref<4x8xi32, #tpu.memory_space<smem>>, %arg2: memref<4x2xi32, #tpu.memory_space<smem>>) -> (i32, i32, i32) {
    %c0_i32 = arith.constant 0 : i32
    %c0_i32_0 = arith.constant 0 : i32
    %c0_i32_1 = arith.constant 0 : i32
    %c0_i32_2 = arith.constant 0 : i32
    return %c0_i32, %c0_i32_0, %c0_i32_1 : i32, i32, i32
  }
  func.func @transform_4(%arg0: i32, %arg1: memref<4x8xi32, #tpu.memory_space<smem>>, %arg2: memref<4x2xi32, #tpu.memory_space<smem>>) -> (i32, i32, i32) {
    %c0_i32 = arith.constant 0 : i32
    %c0_i32_0 = arith.constant 0 : i32
    %c0_i32_1 = arith.constant 0 : i32
    %c0_i32_2 = arith.constant 0 : i32
    return %c0_i32, %c0_i32_0, %c0_i32_1 : i32, i32, i32
  }
  func.func @transform_5(%arg0: i32, %arg1: memref<4x8xi32, #tpu.memory_space<smem>>, %arg2: memref<4x2xi32, #tpu.memory_space<smem>>) -> (i32, i32) {
    %c0_i32 = arith.constant 0 : i32
    %c0_i32_0 = arith.constant 0 : i32
    %c0_i32_1 = arith.constant 0 : i32
    return %c0_i32, %c0_i32_0 : i32, i32
  }
  func.func @transform_6(%arg0: i32, %arg1: memref<4x8xi32, #tpu.memory_space<smem>>, %arg2: memref<4x2xi32, #tpu.memory_space<smem>>) -> (i32, i32, i32) {
    %c0_i32 = arith.constant 0 : i32
    %c0_i32_0 = arith.constant 0 : i32
    %c0_i32_1 = arith.constant 0 : i32
    return %arg0, %c0_i32, %c0_i32_0 : i32, i32, i32
  }
}

</mosaic_0001>

<bundles_post_ra>
// kernel: re_forward.1
= control target key start
LH: loop header
LB: loop body
LE: loop exit
PB: predicated region body
PF: predicated region fallthrough
CT: control target
= control target key end

     0   :  { %s3234_s0 = inlined_call_operand.vmem [shape: s32[4,8], index: 0, kind: input, shape index: {}]   ;;  %s3235_s2 = inlined_call_operand.vmem [shape: f32[4,1,8], index: 2, kind: input, shape index: {}]   ;;  %s3236_s3 = inlined_call_operand.vmem [shape: f32[96,32], index: 3, kind: input, shape index: {}]   ;;  %s3237_s4 = inlined_call_operand.vmem [shape: f32[2,32,384], index: 4, kind: input, shape index: {}]   ;;  %s3238_s5 = inlined_call_operand.vmem [shape: f32[2,64,32], index: 5, kind: input, shape index: {}]   ;;  %s3239_s6 = inlined_call_operand.vmem [shape: f32[2,8,128], index: 6, kind: input, shape index: {}]   ;;  %s3240_s7 = inlined_call_operand.vmem [shape: f32[72,128], index: 7, kind: input, shape index: {}]   ;;  %s3241_s8 = inlined_call_operand.vmem [shape: f32[4,8,128], index: 8, kind: output, shape index: {}]   ;;  %s3242_s1 = inlined_call_operand.vmem [shape: s32[4,2], index: 1, kind: input, shape index: {}]  }
   0x1   :  { %s13_s29 = sshll.u32 %s3234_s0, 4  ;;  %s17_s10 = sshll.u32 %s3242_s1, 4  ;;  %s14_s29 = int_to_ptr.vmem [resolvable:$true] %s13_s29  ;;  %s18_s10 = int_to_ptr.vmem [resolvable:$true] %s17_s10 }
   0x2   :  { %s2706_s11 = scalar_lea.vmem %s14_s29, 64  ;;  %p2711_p1 = scmp.lt.s32.totalorder %s14_s29, %s14_s29 }
   0x3   :  { %p2707_p0 = scmp.ne.s32.totalorder %s14_s29, %s2706_s11  ;;  %p2712_p2 = scmp.lt.s32.totalorder %s2706_s11, %s2706_s11 }
   0x5   :  { %p2713_p3 = por %p2712_p2, %p2711_p1 }
   0x7   :  { %p2714_p4 = pnand %p2713_p3, %p2707_p0 }
   0x9   :  { %2717 = shalt.err (!%p2714_p4)  }
   0xa   :  { %s2740_s12 = smov [#allocation4]   ;;  %s2718_s13 = scalar_lea.vmem %s18_s10, 64 }
   0xb   :  { %16 = dma.vmem_to_smem %s14_s29, 64, %s2740_s12, [#allocation3] }
   0xc   :  { %p2719_p5 = scmp.ne.s32.totalorder %s18_s10, %s2718_s13  ;;  %p2723_p6 = scmp.lt.s32.totalorder %s18_s10, %s18_s10 }
   0xd   :  { %p2724_p7 = scmp.lt.s32.totalorder %s2718_s13, %s2718_s13 }
   0xf   :  { %p2725_p8 = por %p2724_p7, %p2723_p6 }
  0x11   :  { %p2726_p9 = pnand %p2725_p8, %p2719_p5 }
  0x13   :  { %2729 = shalt.err (!%p2726_p9)  }
  0x14   :  { %s2741_s0 = smov [#allocation5]  }
  0x15   :  { %20 = dma.vmem_to_smem %s18_s10, 64, %s2741_s0, [#allocation3] }
  0x16   :  { %2734 = dma.done.wait [#allocation3], 128 }
  0x17   :  { %2735 = vsyncadd [#allocation3], 4294967168 }
  0x18   :  { %22 = sfence }
  0x19   :  { %s2801_s1 = smov 0  }
  0x1a LB: > { %s2807_s14 = sadd.s32 4294967295, %s2738_s1   ;;  %p2253_p10 = scmp.ge.s32.totalorder %s2738_s1, 1  ;;  %s2738_s1 = sphi %s2801_s1, %s28_s1  }
  0x1b   : > { %p222_p11 = scmp.lt.s32.totalorder %s2738_s1, 5 }
  0x1d   : > { %p223_p12 = pnand %p2253_p10, %p222_p11 }
  0x1e   : > { %s2812_s15 = sshll.u32 (!%p223_p12), %s2807_s14, 7  ;;  %vm260_vm0 = vcmask (!%p223_p12), 253952   ;;  %v298_v8 = vld [vmem:[%s3236_s3 + $0x40] sm:$0xff] (!%p223_p12)  ;;  %v2256_v10 = vld [vmem:[%s3236_s3 + $0x48] ss:$0 sm:$0xff] (!%p223_p12)  ;;  %vm308_vm1 = vcmask (!%p223_p12), 261120   ;;  %v428_v44 = vlaneseq (!%p223_p12) }
  0x1f   : > { %226 = sbr.rel (%p223_p12) target bundleno = 5556 (0x15b4), region = 44  ;;  %s257_s16 = sld [smem:[#allocation4 + %s2812_s15]] (!%p223_p12)  ;;  %v336_v19 = vld [vmem:[%s3237_s4] sm:$0xff] (!%p223_p12)  ;;  %v337_v20 = vld [vmem:[%s3237_s4 + $0x18] sm:$0xff] (!%p223_p12)  ;;  %v338_v21 = vld [vmem:[%s3237_s4 + $0x30] sm:$0xff] (!%p223_p12)  ;;  %v2742_v22 = vmov (!%p223_p12), 0.0|0.0  }
  0x20   : > { %s262_s17 = sadd.s32 (!%p223_p12), 1, %s2812_s15  ;;  %s267_s19 = sadd.s32 (!%p223_p12), 2, %s2812_s15  ;;  %2586 = vmatprep.subr.bf16.mxu0 (!%p223_p12), %v2742_v22  ;;  %v2587_v23 = vpack.c.bf16 (!%p223_p12), %v337_v20, %v336_v19  ;;  %v339_v24 = vld [vmem:[%s3237_s4 + $0x48] sm:$0xff] (!%p223_p12)  ;;  %vm2743_vm2 = vmmov (!%p223_p12), 0   ;;  %v2744_v25 = vmov (!%p223_p12), 0.0   ;;  %vm436_vm3 = vcmask (!%p223_p12), 130048  }
  0x21   : > { %s263_s18 = sld [smem:[#allocation4 + %s262_s17]] (!%p223_p12)  ;;  %s272_s21 = sadd.s32 (!%p223_p12), 3, %s2812_s15  ;;  %2417 = vmatprep.mubr.msk.f32.mxu0 (!%p223_p12), %vm2743_vm2, %v2744_v25  ;;  %2420 = vmatprep.subr.mxu1 (!%p223_p12), %v2744_v25  ;;  %v2590_v26 = vpack.c.bf16 (!%p223_p12), %v339_v24, %v338_v21  ;;  %v2257_v31 = vld [vmem:[%s3236_s3 + $0x50] ss:$0 sm:$0xff] (!%p223_p12)  ;;  %v2258_v33 = vld [vmem:[%s3236_s3 + $0x58] ss:$0 sm:$0xff] (!%p223_p12) }
  0x22   : > { %s268_s20 = sld [smem:[#allocation4 + %s267_s19]] (!%p223_p12)  ;;  %s277_s23 = sadd.s32 (!%p223_p12), 4, %s2812_s15  ;;  %2422 = vmatprep.mubr.msk.f32.mxu1 (!%p223_p12), %vm2743_vm2, %v2744_v25  ;;  %2588 = vmatpush3.bf16.msra.mxu0 (!%p223_p12), %v2587_v23  ;;  %v2259_v36 = vld [vmem:[%s3239_s6] ss:$0 sm:$0xff] (!%p223_p12)  ;;  %v2921_v47 = vshrl.u32 (!%p223_p12), %v428_v44, 7  ;;  %vm512_vm4 = vcmask (!%p223_p12), 64512  }
  0x23   : > { %s273_s22 = sld [smem:[#allocation4 + %s272_s21]] (!%p223_p12)  ;;  %s282_s25 = sadd.s32 (!%p223_p12), 5, %s2812_s15  ;;  %2589 = vmatprep.subr.bf16.mxu0 (!%p223_p12), %v2742_v22  ;;  %vm1043_vm5 = vcmask (!%p223_p12), 523264  }
  0x24   : > { %s278_s24 = sld [smem:[#allocation4 + %s277_s23]] (!%p223_p12)  ;;  %s287_s27 = sadd.s32 (!%p223_p12), 6, %s2812_s15  ;;  %v430_v49 = vsub.s32 (!%p223_p12), 0, %v2921_v47  ;;  %vm1950_vm6 = vcmp.eq.s32.totalorder (!%p223_p12), %v2921_v47, 0 }
  0x25   : > { %s283_s26 = sld [smem:[#allocation4 + %s282_s25]] (!%p223_p12)  ;;  %s258_s30 = scalar_lea.vmem (!%p223_p12), %s3236_s3, %s257_s16 }
  0x26   : > { %s288_s9 = sld [smem:[#allocation4 + %s287_s27]]  ;;  %v259_v0 = vld [vmem:[%s258_s30] sm:$0x1]  ;;  %s292_s13 = sadd.s32 7, %s2812_s15  ;;  %2591 = vmatpush3.bf16.msra.mxu0 %v2590_v26 }
  0x27   : > { %s264_s12 = scalar_lea.vmem %s3236_s3, %s263_s18  ;;  %261 = vst.msk [vmem:[#allocation2] sm:$0x1] %vm260_vm0, %v259_v0  ;;  %s293_s23 = sld [smem:[#allocation4 + %s292_s13]]  ;;  %2430 = vmatprep.subr.mxu0 %v2744_v25 }
  0x28   : > { %v265_v1 = vld [vmem:[%s264_s12] sm:$0x1]  ;;  %s269_s21 = scalar_lea.vmem %s3236_s3, %s268_s20  ;;  %s2745_s13 = smov 96  }
  0x29   : > { %266 = vst.msk [vmem:[#allocation2 + $0x1] sm:$0x1] %vm260_vm0, %v265_v1  ;;  %v270_v2 = vld [vmem:[%s269_s21] sm:$0x1]  ;;  %s274_s27 = scalar_lea.vmem %s3236_s3, %s273_s22  ;;  %p249_p13 = scmp.lt.s32.totalorder %s2807_s14, 3 }
  0x2a   : > { %271 = vst.msk [vmem:[#allocation2 + $0x2] sm:$0x1] %vm260_vm0, %v270_v2  ;;  %v275_v3 = vld [vmem:[%s274_s27] sm:$0x1]  ;;  %s279_s29 = scalar_lea.vmem %s3236_s3, %s278_s24  ;;  %s1944_s27 = sld [smem:[#allocation5 + %s2812_s15]] }
  0x2b   : > { %276 = vst.msk [vmem:[#allocation2 + $0x3] sm:$0x1] %vm260_vm0, %v275_v3  ;;  %v280_v4 = vld [vmem:[%s279_s29] sm:$0x1]  ;;  %s284_s10 = scalar_lea.vmem %s3236_s3, %s283_s26  ;;  %s2747_s26 = smov 80  }
  0x2c   : > { %281 = vst.msk [vmem:[#allocation2 + $0x4] sm:$0x1] %vm260_vm0, %v280_v4  ;;  %v285_v5 = vld [vmem:[%s284_s10] sm:$0x1]  ;;  %s289_s22 = scalar_lea.vmem %s3236_s3, %s288_s9  ;;  %s3244_s14 = smov (!%p249_p13, %s2807_s14), 3 }
  0x2d   : > { %286 = vst.msk [vmem:[#allocation2 + $0x5] sm:$0x1] %vm260_vm0, %v285_v5  ;;  %v290_v6 = vld [vmem:[%s289_s22] sm:$0x1]  ;;  %s294_s0 = scalar_lea.vmem %s3236_s3, %s293_s23  ;;  %s251_s25 = scalar_lea.vmem %s3235_s2, %s3244_s14 }
  0x2e   : > { %291 = vst.msk [vmem:[#allocation2 + $0x6] sm:$0x1] %vm260_vm0, %v290_v6  ;;  %v295_v7 = vld [vmem:[%s294_s0] sm:$0x1]  ;;  %s2746_s0 = smov 112   ;;  %s2748_s9 = smov 48  }
  0x2f   : > { %296 = vst.msk [vmem:[#allocation2 + $0x7] sm:$0x1] %vm260_vm0, %v295_v7  ;;  %v333_v45 = vld [vmem:[%s251_s25] sm:$0x1]  ;;  %s2749_s23 = smov 64   ;;  %s1945_s18 = sld [smem:[#allocation5 + %s262_s17]] }
  0x30   : > { %v334_v46 = vsub.f32 1.0, %v333_v45 }
  0x32   : > { %v335_v48 = vmul.f32 -1e+09, %v334_v46 }
  0x34   : > { %v2926_v50 = vrot.slane %v335_v48, %v430_v49 }
  0x36   : > { %v297_v9 = vld [vmem:[#allocation2] sm:$0xff] }
  0x37   : > { %v299_v11 = vadd.f32 %v298_v8, %v297_v9 }
  0x39   : > { %v305_v12 = vadd.f32 %v2256_v10, %v299_v11  ;;  %v340_v10 = vld [vmem:[%s3237_s4 + $0x8] sm:$0xff]  ;;  %v341_v11 = vld [vmem:[%s3237_s4 + $0x20] sm:$0xff] }
  0x3b   : > { %v309_v13 = vsel %vm308_vm1, %v305_v12, 0.0 }
  0x3c   : > { %310 = vadd.xlane.f32.xlu0 %v309_v13 }
  0xc9   : > { %v311_v14 = vpop.xlane.xlu0 %310 }
  0xca   : > { %v313_v15 = vmul.f32 0.03125, %v311_v14  ;;  %v2596_v14 = vpack.c.bf16 %v341_v11, %v340_v10 }
  0xcc   : > { %v314_v16 = vsub.f32 %v305_v12, %v313_v15 }
  0xce   : > { %v315_v17 = vmul.f32 %v314_v16, %v314_v16 }
  0xd0   : > { %v316_v18 = vsel %vm308_vm1, %v315_v17, 0.0  ;;  %v343_v17 = vld [vmem:[%s3237_s4 + $0x50] sm:$0xff] }
  0xd1   : > { %317 = vadd.xlane.f32.xlu0 %v316_v18 }
 0x15e   : > { %v318_v27 = vpop.xlane.xlu0 %317 }
 0x15f   : > { %v319_v28 = vmul.f32 0.03125, %v318_v27 }
 0x161   : > { %v320_v29 = vadd.f32 1e-12, %v319_v28  ;;  %v2269_v28 = vld [vmem:[%s3239_s6 + $0x1] ss:$0 sm:$0xff] }
 0x163   : > { %2676 = vrsqrt.f32 %v320_v29 }
 0x16d   : > { %v2677_v30 = vpop.eup %2676 }
 0x16e   : > { %v322_v32 = vmul.f32 %v2677_v30, %v314_v16  ;;  %v342_v16 = vld [vmem:[%s3237_s4 + $0x38] sm:$0xff] }
 0x16f   : > { %v2593_v18 = vpack.c.bf16 %v343_v17, %v342_v16 }
 0x170   : > { %v327_v34 = vmul.f32 %v2257_v31, %v322_v32 }
 0x172   : > { %v2890_v35 = vadd.f32 %v2258_v33, %v327_v34 }
 0x174   : > { %2418 = vmatmul.mubr.msk.f32.vlgmr.msra.gmra.mrb[0].mxu0 %vm308_vm1, %v2890_v35 }
 0x175   : > { %2432 = vmatprep.mubr.msk.f32.mxu0 %vm2743_vm2, %v2744_v25 }
 0x247   : > { %v422_v37 = vpop.f32.mrb[0].mxu0 }
 0x248   : > { %v423_v38 = vadd.f32 %v2259_v36, %v422_v37  ;;  %v2419_v39 = vpop.f32.mrb[1].mxu0 }
 0x24a   : > { %434 = vrot.lane.b32.xlu1 %v423_v38, %s2745_s13  ;;  %v426_v40 = vmul.f32 0.25, %v423_v38 }
 0x24c   : > { %600 = vrot.lane.b32.xlu0 %v426_v40, %s2746_s0 }
 0x24e   : > { %602 = vrot.lane.b32.xlu1 %v423_v38, %s2747_s26 }
 0x2bc   : > { %v435_v41 = vpop.permute.xlu1 %434 }
 0x2bd   : > { %2421 = vmatpush3.xpose.msk.msra.mxu1 %vm436_vm3, %v435_v41  ;;  %v345_v41 = vld [vmem:[%s3237_s4 + $0x28] sm:$0xff] }
 0x2be   : > { %2425 = vmatprep.subr.mxu1 %v2744_v25  ;;  %v601_v43 = vpop.permute.xlu0 %600 }
 0x2c0   : > { %v603_v42 = vpop.permute.xlu1 %602  ;;  %2423 = vmatmul.mubr.msk.f32.vlgmr.msra.gmra.mrb[0].mxu1 %vm436_vm3, %v426_v40  ;;  %v344_v40 = vld [vmem:[%s3237_s4 + $0x10] sm:$0xff] }
 0x2c1   : > { %2431 = vmatpush3.xpose.msk.msra.mxu0 %vm436_vm3, %v603_v42  ;;  %2427 = vmatprep.mubr.msk.f32.mxu1 %vm2743_vm2, %v2744_v25  ;;  %v2599_v42 = vpack.c.bf16 %v345_v41, %v344_v40 }
 0x2c2   : > { %2592 = vmatprep.subr.bf16.mxu0 %v2742_v22 }
 0x2c4   : > { %2433 = vmatmul.mubr.msk.f32.vlgmr.msra.gmra.mrb[2].mxu0 %vm436_vm3, %v601_v43  ;;  %v347_v43 = vld [vmem:[%s3237_s4 + $0x58] sm:$0xff] }
 0x2c5   : > { %2444 = vmatprep.mubr.msk.f32.mxu0 %vm2743_vm2, %v2744_v25  ;;  %2594 = vmatpush3.bf16.msra.mxu0 %v2593_v18 }
 0x2c6   : > { %2598 = vmatprep.subr.bf16.mxu0 %v2742_v22 }
 0x393   : > { %v508_v51 = vpop.f32.mrb[0].mxu1 }
 0x394   : > { %v509_v52 = vadd.f32 %v508_v51, %v2926_v50  ;;  %v2424_v53 = vpop.f32.mrb[1].mxu1 }
 0x395   : > { %v2270_v53 = vld [vmem:[%s3239_s6 + $0x2] ss:$0 sm:$0xff] }
 0x396   : > { %v513_v54 = vsel %vm512_vm4, %v509_v52, -inf }
 0x397   : > { %v674_v55 = vpop.f32.mrb[2].mxu0  ;;  %514 = vmax.xlane.f32.xlu1 %v513_v54 }
 0x398   : > { %v675_v56 = vadd.f32 %v674_v55, %v2926_v50  ;;  %v2434_v57 = vpop.f32.mrb[3].mxu0  ;;  %v2271_v55 = vld [vmem:[%s3239_s6 + $0x3] ss:$0 sm:$0xff] }
 0x39a   : > { %v678_v58 = vsel %vm512_vm4, %v675_v56, -inf }
 0x39b   : > { %679 = vmax.xlane.f32.xlu0 %v678_v58  ;;  %v1030_v58 = vld [vmem:[%s3238_s5] sm:$0xff] }
 0x3b1   : > { %689 = vrot.lane.b32.xlu0 %v423_v38, %s2748_s9 }
 0x424   : > { %v515_v59 = vpop.xlane.xlu1 %514 }
 0x425   : > { %v516_v60 = vsub.f32 %v509_v52, %v515_v59  ;;  %v1031_v59 = vld [vmem:[%s3238_s5 + $0x8] sm:$0xff] }
 0x427   : > { %v517_v61 = vmul.f32 1.442695, %v516_v60  ;;  %v2605_v60 = vpack.c.bf16 %v1031_v59, %v1030_v58 }
 0x428   : > { %v680_v62 = vpop.xlane.xlu0 %679 }
 0x429   : > { %2678 = vpow2.f32 %v517_v61  ;;  %v681_v63 = vsub.f32 %v675_v56, %v680_v62  ;;  %v1032_v61 = vld [vmem:[%s3238_s5 + $0x10] sm:$0xff]  ;;  %v1033_v62 = vld [vmem:[%s3238_s5 + $0x18] sm:$0xff] }
 0x42b   : > { %v682_v0 = vmul.f32 1.442695, %v681_v63  ;;  %v2608_v63 = vpack.c.bf16 %v1033_v62, %v1032_v61 }
 0x42c   : > { %v690_v12 = vpop.permute.xlu0 %689 }
 0x42d   : > { %2680 = vpow2.f32 %v682_v0  ;;  %v1034_v0 = vld [vmem:[%s3238_s5 + $0x20] sm:$0xff] }
 0x433   : > { %v2679_v1 = vpop.eup %2678 }
 0x434   : > { %v519_v2 = vsel %vm512_vm4, %v2679_v1, 0.0 }
 0x435   : > { %520 = vadd.xlane.f32.xlu1 %v519_v2 }
 0x437   : > { %v2681_v3 = vpop.eup %2680 }
 0x438   : > { %v684_v4 = vsel %vm512_vm4, %v2681_v3, 0.0 }
 0x439   : > { %685 = vadd.xlane.f32.xlu1 %v684_v4  ;;  %v1037_v4 = vld [vmem:[%s3238_s5 + $0x38] sm:$0xff] }
 0x44a   : > { %524 = vrot.lane.b32.xlu1 %v423_v38, %s2749_s23 }
 0x4c2   : > { %v521_v5 = vpop.xlane.xlu1 %520 }
 0x4c3   : > { %2682 = vrcp.f32 %v521_v5 }
 0x4c6   : > { %v686_v6 = vpop.xlane.xlu1 %685 }
 0x4c7   : > { %2684 = vrcp.f32 %v686_v6  ;;  %v2272_v6 = vld [vmem:[%s3239_s6 + $0x4] ss:$0 sm:$0xff] }
 0x4ca   : > { %v525_v7 = vpop.permute.xlu1 %524 }
 0x4cb   : > { %2426 = vmatpush3.msra.mxu1 %v525_v7 }
 0x4cc   : > { %2435 = vmatprep.subr.mxu1 %v2744_v25 }
 0x4cd   : > { %v2683_v8 = vpop.eup %2682 }
 0x4ce   : > { %v523_v9 = vmul.f32 %v2683_v8, %v2679_v1  ;;  %v1035_v1 = vld [vmem:[%s3238_s5 + $0x28] sm:$0xff] }
 0x4cf   : > { %v2611_v2 = vpack.c.bf16 %v1035_v1, %v1034_v0 }
 0x4d0   : > { %2428 = vmatmul.mubr.msk.f32.vlgmr.msra.gmra.mrb[2].mxu1 %vm512_vm4, %v523_v9 }
 0x4d1   : > { %v2685_v13 = vpop.eup %2684  ;;  %2436 = vmatpush3.msra.mxu1 %v690_v12  ;;  %2437 = vmatprep.mubr.msk.f32.mxu1 %vm2743_vm2, %v2744_v25 }
 0x4d2   : > { %v688_v15 = vmul.f32 %v2685_v13, %v2681_v3  ;;  %2595 = vmatprep.subr.bf16.mxu1 %v2742_v22  ;;  %v1036_v3 = vld [vmem:[%s3238_s5 + $0x30] sm:$0xff] }
 0x4d3   : > { %v2614_v5 = vpack.c.bf16 %v1037_v4, %v1036_v3 }
 0x4d4   : > { %2438 = vmatmul.mubr.msk.f32.vlgmr.msra.gmra.mrb[4].mxu1 %vm512_vm4, %v688_v15 }
 0x4d5   : > { %2597 = vmatpush3.bf16.msra.mxu1 %v2596_v14  ;;  %2451 = vmatprep.mubr.msk.f32.mxu1 %vm2743_vm2, %v2744_v25 }
 0x4d6   : > { %2604 = vmatprep.subr.bf16.mxu1 %v2742_v22 }
 0x5a3   : > { %v596_v19 = vpop.f32.mrb[2].mxu1 }
 0x5a4   : > { %v2429_v20 = vpop.f32.mrb[3].mxu1  ;;  %2452 = vmatmul.mubr.msk.f32.vlgmr.msra.gmra.mrb[6].mxu1 %vm436_vm3, %v596_v19  ;;  %v2274_v19 = vld [vmem:[%s3239_s6 + $0x5] ss:$0 sm:$0xff] }
 0x5a5   : > { %2481 = vmatprep.mubr.msk.f32.mxu1 %vm2743_vm2, %v2744_v25  ;;  %2606 = vmatpush3.bf16.msra.mxu1 %v2605_v60 }
 0x5a6   : > { %2607 = vmatprep.subr.bf16.mxu1 %v2742_v22 }
 0x5a7   : > { %v761_v21 = vpop.f32.mrb[4].mxu1 }
 0x5a8   : > { %v2439_v23 = vpop.f32.mrb[5].mxu1  ;;  %2445 = vmatmul.mubr.msk.f32.vlgmr.msra.gmra.mrb[4].mxu0 %vm436_vm3, %v761_v21 }
 0x5a9   : > { %2462 = vmatprep.mubr.msk.f32.mxu0 %vm2743_vm2, %v2744_v25  ;;  %2600 = vmatpush3.bf16.msra.mxu0 %v2599_v42 }
 0x5aa   : > { %2601 = vmatprep.subr.bf16.mxu0 %v2742_v22  ;;  %2609 = vmatpush3.bf16.msra.mxu1 %v2608_v63 }
 0x5ab   : > { %2610 = vmatprep.subr.bf16.mxu1 %v2742_v22 }
 0x5ae   : > { %2612 = vmatpush3.bf16.msra.mxu1 %v2611_v2 }
 0x5af   : > { %2613 = vmatprep.subr.bf16.mxu1 %v2742_v22 }
 0x5b2   : > { %2615 = vmatpush3.bf16.msra.mxu1 %v2614_v5 }
 0x5b3   : > { %2500 = vmatprep.subr.mxu1 %v2744_v25 }
 0x677   : > { %v907_v24 = vpop.f32.mrb[6].mxu1 }
 0x678   : > { %v2453_v26 = vpop.f32.mrb[7].mxu1 }
 0x67b   : > { %v834_v27 = vpop.f32.mrb[4].mxu0 }
 0x67c   : > { %v908_v29 = vadd.f32 %v907_v24, %v834_v27  ;;  %v2446_v30 = vpop.f32.mrb[5].mxu0 }
 0x67e   : > { %v916_v31 = vadd.f32 %v2269_v28, %v908_v29 }
 0x680   : > { %v917_v32 = vadd.f32 %v916_v31, %v2890_v35  ;;  %v346_v35 = vld [vmem:[%s3237_s4 + $0x40] sm:$0xff] }
 0x681   : > { %v2602_v45 = vpack.c.bf16 %v347_v43, %v346_v35  ;;  %v2276_v35 = vld [vmem:[%s3239_s6 + $0x6] ss:$0 sm:$0xff] }
 0x682   : > { %v920_v33 = vsel %vm308_vm1, %v917_v32, 0.0 }
 0x683   : > { %921 = vadd.xlane.f32.xlu1 %v920_v33  ;;  %2603 = vmatpush3.bf16.msra.mxu0 %v2602_v45  ;;  %v2279_v33 = vld [vmem:[%s3237_s4 + $0x78] sm:$0xff]  ;;  %v2277_v45 = vld [vmem:[%s3239_s6 + $0x7] ss:$0 sm:$0xff] }
 0x684   : > { %2616 = vmatprep.subr.bf16.mxu0 %v2742_v22 }
 0x710   : > { %v922_v34 = vpop.xlane.xlu1 %921 }
 0x711   : > { %v923_v36 = vmul.f32 0.03125, %v922_v34 }
 0x713   : > { %v924_v37 = vsub.f32 %v917_v32, %v923_v36  ;;  %v2278_v32 = vld [vmem:[%s3237_s4 + $0x60] sm:$0xff]  ;;  %v2280_v36 = vld [vmem:[%s3237_s4 + $0x90] sm:$0xff] }
 0x714   : > { %v2617_v34 = vpack.c.bf16 %v2279_v33, %v2278_v32 }
 0x715   : > { %v925_v38 = vmul.f32 %v924_v37, %v924_v37 }
 0x717   : > { %v926_v39 = vsel %vm308_vm1, %v925_v38, 0.0 }
 0x718   : > { %927 = vadd.xlane.f32.xlu0 %v926_v39 }
 0x7a5   : > { %v928_v46 = vpop.xlane.xlu0 %927 }
 0x7a6   : > { %v929_v48 = vmul.f32 0.03125, %v928_v46 }
 0x7a8   : > { %v930_v51 = vadd.f32 1e-12, %v929_v48 }
 0x7aa   : > { %2686 = vrsqrt.f32 %v930_v51  ;;  %v2291_v51 = vld [vmem:[%s3239_s6 + $0x8] ss:$0 sm:$0xff] }
 0x7b4   : > { %v2687_v52 = vpop.eup %2686 }
 0x7b5   : > { %v932_v54 = vmul.f32 %v2687_v52, %v924_v37  ;;  %v2281_v37 = vld [vmem:[%s3237_s4 + $0xa8] sm:$0xff] }
 0x7b6   : > { %v2620_v38 = vpack.c.bf16 %v2281_v37, %v2280_v36  ;;  %v2302_v36 = vld [vmem:[%s3239_s6 + $0x9] ss:$0 sm:$0xff] }
 0x7b7   : > { %v937_v56 = vmul.f32 %v2270_v53, %v932_v54 }
 0x7b9   : > { %v942_v57 = vadd.f32 %v2271_v55, %v937_v56 }
 0x7bb   : > { %2463 = vmatmul.mubr.msk.f32.vlgmr.msra.gmra.mrb[6].mxu0 %vm308_vm1, %v942_v57 }
 0x7bc   : > { %2492 = vmatprep.mubr.msk.f32.mxu0 %vm2743_vm2, %v2744_v25  ;;  %2618 = vmatpush3.bf16.msra.mxu0 %v2617_v34 }
 0x7bd   : > { %2619 = vmatprep.subr.bf16.mxu0 %v2742_v22 }
 0x7c0   : > { %2621 = vmatpush3.bf16.msra.mxu0 %v2620_v38 }
 0x7c1   : > { %2495 = vmatprep.subr.mxu0 %v2744_v25 }
 0x88e   : > { %v1017_v7 = vpop.f32.mrb[6].mxu0 }
 0x88f   : > { %v1018_v8 = vadd.f32 %v2272_v6, %v1017_v7  ;;  %v2464_v9 = vpop.f32.mrb[7].mxu0 }
 0x891   : > { %v1022_v10 = vmul.f32 0.044715, %v1018_v8  ;;  %v1021_v16 = vmul.f32 0.5, %v1018_v8 }
 0x893   : > { %v1023_v11 = vmul.f32 %v1022_v10, %v1018_v8 }
 0x895   : > { %v1024_v12 = vmul.f32 %v1023_v11, %v1018_v8 }
 0x897   : > { %v1025_v13 = vadd.f32 %v1024_v12, %v1018_v8 }
 0x899   : > { %v1026_v14 = vmul.f32 0.7978846, %v1025_v13 }
 0x89b   : > { %2688 = vtanh.f32 %v1026_v14 }
 0x8a5   : > { %v2689_v15 = vpop.eup %2688 }
 0x8a6   : > { %v1028_v17 = vadd.f32 1.0, %v2689_v15 }
 0x8a8   : > { %v1029_v18 = vmul.f32 %v1028_v17, %v1021_v16  ;;  %v2282_v17 = vld [vmem:[%s3237_s4 + $0x68] sm:$0xff] }
 0x8aa   : > { %2482 = vmatmul.mubr.msk.f32.vlgmr.msra.gmra.mrb[8].mxu1 %vm1043_vm5, %v1029_v18  ;;  %v2283_v18 = vld [vmem:[%s3237_s4 + $0x80] sm:$0xff] }
 0x8ab   : > { %2502 = vmatprep.mubr.msk.f32.mxu1 %vm2743_vm2, %v2744_v25 }
 0x97d   : > { %v1113_v20 = vpop.f32.mrb[8].mxu1 }
 0x97e   : > { %v1114_v21 = vadd.f32 %v2274_v19, %v1113_v20  ;;  %v2483_v23 = vpop.f32.mrb[9].mxu1 }
 0x980   : > { %v1117_v24 = vadd.f32 %v1114_v21, %v942_v57  ;;  %v2626_v21 = vpack.c.bf16 %v2283_v18, %v2282_v17 }
 0x982   : > { %v1120_v26 = vsel %vm308_vm1, %v1117_v24, 0.0 }
 0x983   : > { %1121 = vadd.xlane.f32.xlu1 %v1120_v26  ;;  %v2285_v26 = vld [vmem:[%s3237_s4 + $0xb0] sm:$0xff] }
 0xa10   : > { %v1122_v27 = vpop.xlane.xlu1 %1121 }
 0xa11   : > { %v1123_v28 = vmul.f32 0.03125, %v1122_v27 }
 0xa13   : > { %v1124_v29 = vsub.f32 %v1117_v24, %v1123_v28  ;;  %v2284_v24 = vld [vmem:[%s3237_s4 + $0x98] sm:$0xff] }
 0xa14   : > { %v2623_v27 = vpack.c.bf16 %v2285_v26, %v2284_v24 }
 0xa15   : > { %v1125_v30 = vmul.f32 %v1124_v29, %v1124_v29 }
 0xa17   : > { %v1126_v31 = vsel %vm308_vm1, %v1125_v30, 0.0 }
 0xa18   : > { %1127 = vadd.xlane.f32.xlu1 %v1126_v31 }
 0xaa5   : > { %v1128_v39 = vpop.xlane.xlu1 %1127 }
 0xaa6   : > { %v1129_v40 = vmul.f32 0.03125, %v1128_v39 }
 0xaa8   : > { %v1130_v41 = vadd.f32 1e-12, %v1129_v40 }
 0xaaa   : > { %2690 = vrsqrt.f32 %v1130_v41 }
 0xab4   : > { %v2691_v42 = vpop.eup %2690 }
 0xab5   : > { %v1132_v43 = vmul.f32 %v2691_v42, %v1124_v29 }
 0xab7   : > { %v1137_v46 = vmul.f32 %v2276_v35, %v1132_v43 }
 0xab9   : > { %v3052_v48 = vadd.f32 %v2277_v45, %v1137_v46 }
 0xabb   : > { %2493 = vmatmul.mubr.msk.f32.vlgmr.msra.gmra.mrb[8].mxu0 %vm308_vm1, %v3052_v48 }
 0xabc   : > { %2497 = vmatprep.mubr.msk.f32.mxu0 %vm2743_vm2, %v2744_v25 }
 0xb8e   : > { %v1231_v52 = vpop.f32.mrb[8].mxu0 }
 0xb8f   : > { %v1232_v53 = vadd.f32 %v2291_v51, %v1231_v52  ;;  %v2494_v54 = vpop.f32.mrb[9].mxu0  ;;  %v2286_v51 = vld [vmem:[%s3237_s4 + $0x70] sm:$0xff]  ;;  %v2287_v52 = vld [vmem:[%s3237_s4 + $0x88] sm:$0xff] }
 0xb90   : > { %v2289_v54 = vld [vmem:[%s3237_s4 + $0xb8] sm:$0xff] }
 0xb91   : > { %1403 = vrot.lane.b32.xlu0 %v1232_v53, %s2747_s26  ;;  %1237 = vrot.lane.b32.xlu1 %v1232_v53, %s2745_s13  ;;  %v1235_v55 = vmul.f32 0.25, %v1232_v53 }
 0xb95   : > { %1401 = vrot.lane.b32.xlu1 %v1235_v55, %s2746_s0 }
 0xc03   : > { %v1238_v56 = vpop.permute.xlu1 %1237  ;;  %v1404_v57 = vpop.permute.xlu0 %1403 }
 0xc04   : > { %2496 = vmatpush3.xpose.msk.msra.mxu0 %vm436_vm3, %v1238_v56 }
 0xc05   : > { %2505 = vmatprep.subr.mxu0 %v2744_v25 }
 0xc07   : > { %2498 = vmatmul.mubr.msk.f32.vlgmr.msra.gmra.mrb[10].mxu0 %vm436_vm3, %v1235_v55  ;;  %v1402_v58 = vpop.permute.xlu1 %1401 }
 0xc08   : > { %2506 = vmatpush3.xpose.msk.msra.mxu0 %vm436_vm3, %v1404_v57  ;;  %2507 = vmatprep.mubr.msk.f32.mxu0 %vm2743_vm2, %v2744_v25 }
 0xc09   : > { %2622 = vmatprep.subr.bf16.mxu0 %v2742_v22 }
 0xc0b   : > { %2508 = vmatmul.mubr.msk.f32.vlgmr.msra.gmra.mrb[12].mxu0 %vm436_vm3, %v1402_v58 }
 0xc0c   : > { %2519 = vmatprep.mubr.msk.f32.mxu0 %vm2743_vm2, %v2744_v25  ;;  %2624 = vmatpush3.bf16.msra.mxu0 %v2623_v27  ;;  %v2319_v27 = vld [vmem:[%s3239_s6 + $0xd] ss:$0 sm:$0xff] }
 0xc0d   : > { %2628 = vmatprep.subr.bf16.mxu0 %v2742_v22 }
 0xcda   : > { %v1310_v59 = vpop.f32.mrb[10].mxu0 }
 0xcdb   : > { %v1311_v60 = vadd.f32 %v1310_v59, %v2926_v50  ;;  %v2499_v61 = vpop.f32.mrb[11].mxu0 }
 0xcdd   : > { %v1314_v62 = vsel %vm512_vm4, %v1311_v60, -inf }
 0xcde   : > { %1315 = vmax.xlane.f32.xlu1 %v1314_v62  ;;  %v1475_v63 = vpop.f32.mrb[12].mxu0  ;;  %v2306_v62 = vld [vmem:[%s3239_s6 + $0xb] ss:$0 sm:$0xff] }
 0xcdf   : > { %v1476_v0 = vadd.f32 %v1475_v63, %v2926_v50  ;;  %v2509_v1 = vpop.f32.mrb[13].mxu0 }
 0xce0   : > { %v2310_v1 = vld [vmem:[%s3238_s5 + $0x40] sm:$0xff] }
 0xce1   : > { %v1479_v2 = vsel %vm512_vm4, %v1476_v0, -inf }
 0xce2   : > { %1480 = vmax.xlane.f32.xlu0 %v1479_v2  ;;  %v2311_v2 = vld [vmem:[%s3238_s5 + $0x48] sm:$0xff] }
 0xd6b   : > { %v1316_v3 = vpop.xlane.xlu1 %1315 }
 0xd6c   : > { %v1317_v4 = vsub.f32 %v1311_v60, %v1316_v3  ;;  %v2305_v60 = vld [vmem:[%s3239_s6 + $0xa] ss:$0 sm:$0xff]  ;;  %v2635_v3 = vpack.c.bf16 %v2311_v2, %v2310_v1  ;;  %v2037_v1 = vld [vmem:[%s3240_s7 + $0x38] sm:$0xff] }
 0xd6e   : > { %v1318_v5 = vmul.f32 1.442695, %v1317_v4  ;;  %v2312_v4 = vld [vmem:[%s3238_s5 + $0x50] sm:$0xff] }
 0xd6f   : > { %v1481_v6 = vpop.xlane.xlu0 %1480 }
 0xd70   : > { %2692 = vpow2.f32 %v1318_v5  ;;  %v1482_v7 = vsub.f32 %v1476_v0, %v1481_v6  ;;  %v2313_v5 = vld [vmem:[%s3238_s5 + $0x58] sm:$0xff] }
 0xd71   : > { %v2638_v6 = vpack.c.bf16 %v2313_v5, %v2312_v4 }
 0xd72   : > { %v1483_v8 = vmul.f32 1.442695, %v1482_v7  ;;  %v2314_v7 = vld [vmem:[%s3238_s5 + $0x60] sm:$0xff] }
 0xd74   : > { %2694 = vpow2.f32 %v1483_v8  ;;  %v2315_v8 = vld [vmem:[%s3238_s5 + $0x68] sm:$0xff] }
 0xd7a   : > { %v2693_v9 = vpop.eup %2692 }
 0xd7b   : > { %v1320_v10 = vsel %vm512_vm4, %v2693_v9, 0.0 }
 0xd7c   : > { %1321 = vadd.xlane.f32.xlu0 %v1320_v10  ;;  %v2316_v10 = vld [vmem:[%s3238_s5 + $0x70] sm:$0xff] }
 0xd7e   : > { %v2695_v11 = vpop.eup %2694 }
 0xd7f   : > { %v1485_v12 = vsel %vm512_vm4, %v2695_v11, 0.0 }
 0xd80   : > { %1486 = vadd.xlane.f32.xlu1 %v1485_v12 }
 0xd91   : > { %1490 = vrot.lane.b32.xlu1 %v1232_v53, %s2748_s9  ;;  %s2254_s9 = sshll.u32 %s3244_s14, 3 }
 0xd92   : > { %1325 = vrot.lane.b32.xlu0 %v1232_v53, %s2749_s23  ;;  %v2629_v53 = vpack.c.bf16 %v2287_v52, %v2286_v51  ;;  %v1951_v52 = vstv %s1944_s27  ;;  %s255_s21 = scalar_lea.vmem %s3241_s8, %s2254_s9 }
 0xe09   : > { %v1322_v50 = vpop.xlane.xlu0 %1321 }
 0xe0a   : > { %2696 = vrcp.f32 %v1322_v50  ;;  %v2308_v50 = vld [vmem:[%s3239_s6 + $0xc] ss:$0 sm:$0xff] }
 0xe0d   : > { %v1487_v13 = vpop.xlane.xlu1 %1486  ;;  %v1326_v14 = vpop.permute.xlu0 %1325 }
 0xe0e   : > { %2698 = vrcp.f32 %v1487_v13  ;;  %2501 = vmatpush3.msra.mxu1 %v1326_v14 }
 0xe0f   : > { %2510 = vmatprep.subr.mxu1 %v2744_v25 }
 0xe11   : > { %v1491_v19 = vpop.permute.xlu1 %1490 }
 0xe14   : > { %v2697_v15 = vpop.eup %2696 }
 0xe15   : > { %v1324_v16 = vmul.f32 %v2697_v15, %v2693_v9  ;;  %v2641_v9 = vpack.c.bf16 %v2315_v8, %v2314_v7  ;;  %v2184_v7 = vld [vmem:[%s3240_s7 + $0x40] sm:$0x1] }
 0xe17   : > { %2503 = vmatmul.mubr.msk.f32.vlgmr.msra.gmra.mrb[10].mxu1 %vm512_vm4, %v1324_v16 }
 0xe18   : > { %v2699_v20 = vpop.eup %2698  ;;  %2511 = vmatpush3.msra.mxu1 %v1491_v19  ;;  %2512 = vmatprep.mubr.msk.f32.mxu1 %vm2743_vm2, %v2744_v25 }
 0xe19   : > { %v1489_v23 = vmul.f32 %v2699_v20, %v2695_v11  ;;  %2625 = vmatprep.subr.bf16.mxu1 %v2742_v22  ;;  %v2317_v11 = vld [vmem:[%s3238_s5 + $0x78] sm:$0xff] }
 0xe1a   : > { %v2644_v12 = vpack.c.bf16 %v2317_v11, %v2316_v10 }
 0xe1b   : > { %2513 = vmatmul.mubr.msk.f32.vlgmr.msra.gmra.mrb[12].mxu1 %vm512_vm4, %v1489_v23 }
 0xe1c   : > { %2627 = vmatpush3.bf16.msra.mxu1 %v2626_v21  ;;  %2526 = vmatprep.mubr.msk.f32.mxu1 %vm2743_vm2, %v2744_v25 }
 0xe1d   : > { %2634 = vmatprep.subr.bf16.mxu1 %v2742_v22 }
 0xeea   : > { %v1397_v28 = vpop.f32.mrb[10].mxu1 }
 0xeeb   : > { %v2504_v29 = vpop.f32.mrb[11].mxu1  ;;  %2527 = vmatmul.mubr.msk.f32.vlgmr.msra.gmra.mrb[14].mxu1 %vm436_vm3, %v1397_v28 }
 0xeec   : > { %2556 = vmatprep.mubr.msk.f32.mxu1 %vm2743_vm2, %v2744_v25  ;;  %2636 = vmatpush3.bf16.msra.mxu1 %v2635_v3 }
 0xeed   : > { %2637 = vmatprep.subr.bf16.mxu1 %v2742_v22 }
 0xeee   : > { %v1562_v30 = vpop.f32.mrb[12].mxu1 }
 0xeef   : > { %v2514_v31 = vpop.f32.mrb[13].mxu1  ;;  %2520 = vmatmul.mubr.msk.f32.vlgmr.msra.gmra.mrb[14].mxu0 %vm436_vm3, %v1562_v30 }
 0xef0   : > { %2537 = vmatprep.mubr.msk.f32.mxu0 %vm2743_vm2, %v2744_v25  ;;  %2630 = vmatpush3.bf16.msra.mxu0 %v2629_v53  ;;  %v1952_v53 = vstv %s1945_s18 }
 0xef1   : > { %2631 = vmatprep.subr.bf16.mxu0 %v2742_v22  ;;  %2639 = vmatpush3.bf16.msra.mxu1 %v2638_v6 }
 0xef2   : > { %2640 = vmatprep.subr.bf16.mxu1 %v2742_v22 }
 0xef5   : > { %2642 = vmatpush3.bf16.msra.mxu1 %v2641_v9 }
 0xef6   : > { %2643 = vmatprep.subr.bf16.mxu1 %v2742_v22 }
 0xef9   : > { %2645 = vmatpush3.bf16.msra.mxu1 %v2644_v12 }
 0xefa   : > { %2652 = vmatprep.subr.bf16.mxu1 %v2742_v22 }
 0xfbe   : > { %v1708_v32 = vpop.f32.mrb[14].mxu1 }
 0xfbf   : > { %v2528_v33 = vpop.f32.mrb[15].mxu1 }
 0xfc2   : > { %v1635_v34 = vpop.f32.mrb[14].mxu0 }
 0xfc3   : > { %v1709_v37 = vadd.f32 %v1708_v32, %v1635_v34  ;;  %v2521_v38 = vpop.f32.mrb[15].mxu0 }
 0xfc5   : > { %v1717_v39 = vadd.f32 %v2302_v36, %v1709_v37 }
 0xfc7   : > { %v1718_v40 = vadd.f32 %v1717_v39, %v3052_v48  ;;  %v2288_v48 = vld [vmem:[%s3237_s4 + $0xa0] sm:$0xff] }
 0xfc8   : > { %v2632_v55 = vpack.c.bf16 %v2289_v54, %v2288_v48  ;;  %v2030_v39 = vld [vmem:[%s3240_s7] sm:$0xff]  ;;  %v1949_v48 = vand.u32 127, %v428_v44  ;;  %v1953_v54 = vsel %vm1950_vm6, %v1951_v52, %v1952_v53  ;;  %v2035_v44 = vld [vmem:[%s3240_s7 + $0x28] sm:$0xff] }
 0xfc9   : > { %v1721_v41 = vsel %vm308_vm1, %v1718_v40, 0.0 }
 0xfca   : > { %1722 = vadd.xlane.f32.xlu1 %v1721_v41  ;;  %2633 = vmatpush3.bf16.msra.mxu0 %v2632_v55  ;;  %vm1954_vm7 = vcmp.eq.s32.totalorder %v1949_v48, %v1953_v54 }
 0xfcb   : > { %2559 = vmatprep.subr.mxu0 %v2744_v25 }
0x1057   : > { %v1723_v42 = vpop.xlane.xlu1 %1722 }
0x1058   : > { %v1724_v35 = vmul.f32 0.03125, %v1723_v42  ;;  %v2032_v42 = vld [vmem:[%s3240_s7 + $0x10] sm:$0xff] }
0x105a   : > { %v1725_v43 = vsub.f32 %v1718_v40, %v1724_v35  ;;  %v2031_v40 = vld [vmem:[%s3240_s7 + $0x8] sm:$0xff]  ;;  %v2033_v35 = vld [vmem:[%s3240_s7 + $0x18] sm:$0xff] }
0x105b   : > { %v2653_v41 = vpack.c.bf16 %v2031_v40, %v2030_v39 }
0x105c   : > { %v1726_v45 = vmul.f32 %v1725_v43, %v1725_v43 }
0x105e   : > { %v1727_v46 = vsel %vm308_vm1, %v1726_v45, 0.0 }
0x105f   : > { %1728 = vadd.xlane.f32.xlu0 %v1727_v46 }
0x10ec   : > { %v1729_v56 = vpop.xlane.xlu0 %1728 }
0x10ed   : > { %v1730_v57 = vmul.f32 0.03125, %v1729_v56  ;;  %v2323_v56 = vld [vmem:[%s3239_s6 + $0xe] ss:$0 sm:$0xff] }
0x10ef   : > { %v1731_v58 = vadd.f32 1e-12, %v1730_v57 }
0x10f1   : > { %2700 = vrsqrt.f32 %v1731_v58  ;;  %v2324_v58 = vld [vmem:[%s3239_s6 + $0xf] ss:$0 sm:$0xff] }
0x10fb   : > { %v2701_v59 = vpop.eup %2700 }
0x10fc   : > { %v1733_v61 = vmul.f32 %v2701_v59, %v1725_v43  ;;  %v2656_v43 = vpack.c.bf16 %v2033_v35, %v2032_v42  ;;  %v2034_v59 = vld [vmem:[%s3240_s7 + $0x20] sm:$0xff] }
0x10fe   : > { %v1738_v63 = vmul.f32 %v2305_v60, %v1733_v61 }
0x1100   : > { %v1743_v0 = vadd.f32 %v2306_v62, %v1738_v63  ;;  %v2325_v62 = vsel %vm1954_vm7, 1.0, %v2744_v25  ;;  %v2647_v63 = vpack.c.bf16 %v2035_v44, %v2034_v59 }
0x1102   : > { %2538 = vmatmul.mubr.msk.f32.vlgmr.msra.gmra.mrb[16].mxu0 %vm308_vm1, %v1743_v0 }
0x1103   : > { %2561 = vmatprep.mubr.msk.f32.mxu0 %vm2743_vm2, %v2744_v25 }
0x11d5   : > { %v1818_v13 = vpop.f32.mrb[16].mxu0 }
0x11d6   : > { %v1819_v14 = vadd.f32 %v2308_v50, %v1818_v13  ;;  %v2539_v15 = vpop.f32.mrb[17].mxu0 }
0x11d8   : > { %v1823_v16 = vmul.f32 0.044715, %v1819_v14  ;;  %v1822_v23 = vmul.f32 0.5, %v1819_v14 }
0x11da   : > { %v1824_v17 = vmul.f32 %v1823_v16, %v1819_v14 }
0x11dc   : > { %v1825_v18 = vmul.f32 %v1824_v17, %v1819_v14 }
0x11de   : > { %v1826_v19 = vadd.f32 %v1825_v18, %v1819_v14 }
0x11e0   : > { %v1827_v20 = vmul.f32 0.7978846, %v1826_v19 }
0x11e2   : > { %2702 = vtanh.f32 %v1827_v20 }
0x11ec   : > { %v2703_v21 = vpop.eup %2702 }
0x11ed   : > { %v1829_v24 = vadd.f32 1.0, %v2703_v21 }
0x11ef   : > { %v1830_v26 = vmul.f32 %v1829_v24, %v1822_v23 }
0x11f1   : > { %2557 = vmatmul.mubr.msk.f32.vlgmr.msra.gmra.mrb[16].mxu1 %vm1043_vm5, %v1830_v26 }
0x11f2   : > { %2583 = vmatprep.mubr.msk.f32.mxu1 %vm2743_vm2, %v2744_v25  ;;  %2654 = vmatpush3.bf16.msra.mxu1 %v2653_v41 }
0x11f3   : > { %2655 = vmatprep.subr.bf16.mxu1 %v2742_v22 }
0x11f6   : > { %2657 = vmatpush3.bf16.msra.mxu1 %v2656_v43 }
0x12c4   : > { %v1914_v28 = vpop.f32.mrb[16].mxu1 }
0x12c5   : > { %v1915_v29 = vadd.f32 %v2319_v27, %v1914_v28  ;;  %v2558_v30 = vpop.f32.mrb[17].mxu1 }
0x12c7   : > { %v1918_v31 = vadd.f32 %v1915_v29, %v1743_v0  ;;  %v2036_v0 = vld [vmem:[%s3240_s7 + $0x30] sm:$0xff] }
0x12c8   : > { %v2650_v2 = vpack.c.bf16 %v2037_v1, %v2036_v0 }
0x12c9   : > { %v1921_v32 = vsel %vm308_vm1, %v1918_v31, 0.0 }
0x12ca   : > { %1922 = vadd.xlane.f32.xlu0 %v1921_v32 }
0x1357   : > { %v1923_v33 = vpop.xlane.xlu0 %1922 }
0x1358   : > { %v1924_v34 = vmul.f32 0.03125, %v1923_v33 }
0x135a   : > { %v1925_v36 = vsub.f32 %v1918_v31, %v1924_v34 }
0x135c   : > { %v1926_v37 = vmul.f32 %v1925_v36, %v1925_v36 }
0x135e   : > { %v1927_v38 = vsel %vm308_vm1, %v1926_v37, 0.0 }
0x135f   : > { %1928 = vadd.xlane.f32.xlu1 %v1927_v38 }
0x13ec   : > { %v1929_v45 = vpop.xlane.xlu1 %1928 }
0x13ed   : > { %v1930_v46 = vmul.f32 0.03125, %v1929_v45 }
0x13ef   : > { %v1931_v51 = vadd.f32 1e-12, %v1930_v46 }
0x13f1   : > { %2704 = vrsqrt.f32 %v1931_v51 }
0x13fb   : > { %v2705_v55 = vpop.eup %2704 }
0x13fc   : > { %v1933_v57 = vmul.f32 %v2705_v55, %v1925_v36 }
0x13fe   : > { %v1938_v60 = vmul.f32 %v2323_v56, %v1933_v57 }
0x1400   : > { %v1943_v61 = vadd.f32 %v2324_v58, %v1938_v60 }
0x1402   : > { %2560 = vmatpush3.msra.mxu0 %v1943_v61 }
0x1403   : > { %2562 = vmatmul.mubr.msk.f32.vlgmr.msra.gmra.mrb[18].mxu0 %vm512_vm4, %v2325_v62  ;;  %2646 = vmatprep.subr.bf16.mxu0 %v2742_v22 }
0x1404   : > { %2648 = vmatpush3.bf16.msra.mxu0 %v2647_v63  ;;  %2572 = vmatprep.mubr.msk.f32.mxu0 %vm2743_vm2, %v2744_v25 }
0x1405   : > { %2649 = vmatprep.subr.bf16.mxu0 %v2742_v22 }
0x1408   : > { %2651 = vmatpush3.bf16.msra.mxu0 %v2650_v2 }
0x14d6   : > { %v2026_v3 = vpop.f32.mrb[18].mxu0 }
0x14d7   : > { %v2039_v4 = vrot.slane %v2026_v3, 1  ;;  %v2563_v5 = vpop.f32.mrb[19].mxu0  ;;  %2584 = vmatmul.mubr.msk.f32.vlgmr.msra.gmra.mrb[18].mxu1 %vm308_vm1, %v2026_v3 }
0x14d9   : > { %2573 = vmatmul.mubr.msk.f32.vlgmr.msra.gmra.mrb[20].mxu0 %vm308_vm1, %v2039_v4 }
0x15aa   : > { %v2180_v25 = vpop.f32.mrb[18].mxu1 }
0x15ab   : > { %v2585_v6 = vpop.f32.mrb[19].mxu1 }
0x15ac   : > { %v2108_v22 = vpop.f32.mrb[20].mxu0 }
0x15ad   : > { %v2181_v8 = vadd.f32 %v2180_v25, %v2108_v22  ;;  %v2574_v9 = vpop.f32.mrb[21].mxu0 }
0x15af   : > { %v2185_v10 = vadd.f32 %v2184_v7, %v2181_v8 }
0x15b1   : > { %v2189_v11 = vrot.slane %v2185_v10, %v430_v49 }
0x15b3   : > { %2190 = vst [vmem:[%s255_s21] sm:$0xff] %v2189_v11 }
0x15b4 PF: > { %s28_s1 = sadd.s32 1, %s2738_s1  }
0x15b5   : > { %p25_p0 = scmp.ge.s32.totalorder %s28_s1, 6  }
0x15b7   :  { %27 = sbr.rel (!%p25_p0) target bundleno = 26 (0x1a), region = 85 }

</bundles_post_ra>
